<compile_context>
chip_gen: v7x
topology: tpu7x:2x2x1
jax: 0.10.0
libtpu: 0.0.40
codegen_flags: <defaults>
</compile_context>

<pallas_src>
import numpy as np

import jax
import jax.numpy as jnp
from jax.experimental import pallas as pl
from jax.experimental.pallas import tpu as pltpu
from jax.scipy.special import digamma as jsp_digamma, gammaln as jsp_gammaln


# ----------------------------- in-kernel special functions -------------------
_HALF_LOG_2PI = 0.9189385332046727


def _lgamma_digamma(x):
    """Fused ln Gamma(x) and digamma(x).

    Mosaic does not lower lax.lgamma / lax.digamma, so both are built from
    elementwise primitives: an 8-step recurrence shift followed by the Stirling
    series at z = x + 8.  The shift products, z, log(z), 1/z and 1/z^2 are all
    shared between the two functions (saves ~15-20 VALU ops and 2 EUP pushes
    per element vs. separate routines).

    Accurate to ~1e-6 in f32 for 0 < x <~ 6e4 (the 8-term product must stay in
    f32 range), which holds here since concentrations are exp() of learned
    logits and the prior is 1.
    # TODO(synk): split the product into two 4-term logs (or clamp c) if the
    # training regime can push c above ~6e4.
    """
    x1, x2, x3 = x + 1.0, x + 2.0, x + 3.0
    x4, x5, x6, x7 = x + 4.0, x + 5.0, x + 6.0, x + 7.0
    # Pairwise products, shared by the gammaln shift (one log of the full
    # product) and the digamma shift (one divide of a combined rational).
    d01, n01 = x * x1, x + x1
    d23, n23 = x2 * x3, x2 + x3
    d45, n45 = x4 * x5, x4 + x5
    d67, n67 = x6 * x7, x6 + x7
    d0123 = d01 * d23
    d4567 = d45 * d67
    n0123 = n01 * d23 + n23 * d01
    n4567 = n45 * d67 + n67 * d45
    prod = d0123 * d4567                                   # prod_{i=0..7}(x+i)
    log_shift = jnp.log(prod)                              # sum_i log(x+i)
    recip_shift = (n0123 * d4567 + n4567 * d0123) / prod   # sum_i 1/(x+i)

    z = x + 8.0
    log_z = jnp.log(z)      # shared between lgamma and digamma
    zi = 1.0 / z            # shared
    zi2 = zi * zi

    lgam = ((z - 0.5) * log_z - z + _HALF_LOG_2PI - log_shift
            + zi * (1.0 / 12.0 + zi2 * (-1.0 / 360.0
                    + zi2 * (1.0 / 1260.0 + zi2 * (-1.0 / 1680.0)))))
    digam = (log_z - 0.5 * zi - recip_shift
             - zi2 * (1.0 / 12.0 - zi2 * (1.0 / 120.0 - zi2 * (1.0 / 252.0))))
    return lgam, digam


# ----------------------------------- kernel ----------------------------------
def _label_mixer_kernel(const_ref, p_ref, seg_ref, segt_ref, c_ref, g_ref,
                        alpha_ref, kl_ref):
    c = c_ref[...]               # (TB, L) packed concentrations (rpl rows / lane row)
    g = g_ref[...]               # (TB, L) packed Gamma(c, 1) draws
    p = p_ref[...]               # (1,  L) packed prior concentrations
    seg = seg_ref[...]           # (L, rpl) 0/1 sub-row reduction matrix (resident)
    seg_t = segt_ref[...]        # (rpl, L) 0/1 sub-row broadcast matrix (resident)
    kl_const = const_ref[0, 0]   # sum(gammaln(prior)) - gammaln(sum(prior)), hoisted

    # Within-lane-row reductions / broadcasts on the otherwise idle MXU.
    # NOTE: Mosaic only exposes bf16 (DEFAULT) / fp32 (HIGHEST) contract
    # precision for tpu.matmul; bf16_3x (Precision.HIGH) is not lowerable and
    # DEFAULT would round the data operand to bf16 and break the 1e-5 alpha
    # (sum==1) tolerance, so both dots stay fp32.  They are off the critical
    # path (the kernel is VALU/EUP-bound).
    def rowsum(x):   # (TB, L) -> (TB, rpl): sum over the K lanes of each sub-row
        return jnp.dot(x, seg, precision=jax.lax.Precision.HIGHEST,
                       preferred_element_type=jnp.float32)

    def bcast(x):    # (TB, rpl) -> (TB, L): per-sub-row value to its K lanes
        return jnp.dot(x, seg_t, precision=jax.lax.Precision.HIGHEST,
                       preferred_element_type=jnp.float32)

    # Dirichlet rsample: normalize independent Gamma draws (one divide per row).
    # NOTE: matches the pure-JAX reference; if a whole sub-row of gamma draws
    # underflows to 0 both produce NaN (no epsilon added to stay comparable).
    gsum = rowsum(g)                                   # (TB, rpl)
    alpha_ref[...] = g * bcast(1.0 / gsum)

    # KL( Dir(c) || Dir(prior) ); prior-only terms arrive precomputed in kl_const.
    qsum = rowsum(c)                                   # (TB, rpl)
    lg_c, dg_c = _lgamma_digamma(c)                    # fused: shared shift/log/recip
    lg_q, dg_q = _lgamma_digamma(qsum)
    t = (c - p) * (dg_c - bcast(dg_q)) - lg_c          # single fused elementwise term
    kl_ref[...] = lg_q + kl_const + rowsum(t)


# ---------------------------------- wrapper -----------------------------------
_MAX_PACKED_BLOCK_ROWS = 2048   # <= (2048, 128) f32 tiles; ~6 MiB pipelined VMEM


def _cdiv(a, b):
    return -(-a // b)


def _round_up(x, m):
    return ((x + m - 1) // m) * m


def label_mixer_forward(idx, logc_weight, prior_a, key, return_kl=True):
    """Pallas-backed equivalent of LabelMixer.forward(idx)."""
    N, K = logc_weight.shape
    if N > 1:
        logc = logc_weight[idx]                 # embedding gather (glue)
    else:
        logc = logc_weight
    # TODO(synk): Gamma rejection sampling has no clean Pallas equivalent; the
    # Gamma(c, 1) base draw uses jax.random.gamma, which also forces c to be
    # materialized here (so exp cannot be fused into the kernel without
    # recomputing it).
    c = jnp.exp(logc).astype(jnp.float32)       # (B, K) concentrations
    B = c.shape[0]
    g = jax.random.gamma(key, c).astype(jnp.float32)   # (B, K) Gamma(c, 1) draws

    prior = prior_a.astype(jnp.float32).reshape(1, K)
    # Prior-only KL terms hoisted out of the kernel into one scalar (via SMEM).
    kl_const = (jnp.sum(jsp_gammaln(prior))
                - jsp_gammaln(jnp.sum(prior))).reshape(1, 1).astype(jnp.float32)

    # Lane packing: rpl consecutive rows of width K per 128-wide lane row.
    if K <= 128 and 128 % K == 0:
        rpl = 128 // K
    else:
        rpl = 1   # TODO(synk): lane-sparse fallback for K not dividing 128.
    L = rpl * K

    # Pad only to a multiple of rpl (<= rpl-1 rows, and only when B % rpl != 0).
    # No tile-multiple padding: the ragged last grid block is masked by Pallas,
    # so the wrapper never makes a full extra HBM copy in the common case.
    pad = (-B) % rpl
    if pad:
        c = jnp.pad(c, ((0, pad), (0, 0)), constant_values=1.0)
        g = jnp.pad(g, ((0, pad), (0, 0)), constant_values=1.0)
    b_pack = (B + pad) // rpl
    c_packed = c.reshape(b_pack, L)             # row-major reshape: free
    g_packed = g.reshape(b_pack, L)
    p_packed = jnp.tile(prior, (1, rpl))        # (1, L)

    # 0/1 segment matrices built ONCE here (hoisted out of the per-step kernel
    # body) and kept VMEM-resident via constant index maps.
    lane = np.arange(L)
    sub = np.arange(rpl)
    seg_np = (lane[:, None] // K == sub[None, :]).astype(np.float32)   # (L, rpl)
    seg = jnp.asarray(seg_np)
    seg_t = jnp.asarray(np.ascontiguousarray(seg_np.T))                # (rpl, L)

    # Block sizing: balanced tiles (no 2x padding cliffs), >=2 even grid steps
    # once there is enough work (so both v7x TensorCores get a share), and a
    # single exact full-array block for tiny batches.
    nt = max(1, _cdiv(b_pack, _MAX_PACKED_BLOCK_ROWS))
    if b_pack >= 16:
        nt = max(nt, 2)
        if nt % 2:
            nt += 1
    if nt == 1:
        tbp = b_pack                            # exact full-array block (legal layout)
    else:
        tbp = _round_up(_cdiv(b_pack, nt), 8)   # multiple of 8; last block ragged
    grid = (_cdiv(b_pack, tbp),)

    alpha_packed, kl_packed = pl.pallas_call(
        _label_mixer_kernel,
        out_shape=(
            jax.ShapeDtypeStruct((b_pack, L), jnp.float32),
            jax.ShapeDtypeStruct((b_pack, rpl), jnp.float32),
        ),
        grid=grid,
        in_specs=[
            pl.BlockSpec(memory_space=pltpu.MemorySpace.SMEM),   # hoisted KL constant
            pl.BlockSpec((1, L), lambda i: (0, 0)),              # packed prior
            pl.BlockSpec((L, rpl), lambda i: (0, 0)),            # seg   (resident)
            pl.BlockSpec((rpl, L), lambda i: (0, 0)),            # seg_t (resident)
            pl.BlockSpec((tbp, L), lambda i: (i, 0)),            # packed c
            pl.BlockSpec((tbp, L), lambda i: (i, 0)),            # packed gamma draws
        ],
        out_specs=(
            pl.BlockSpec((tbp, L), lambda i: (i, 0)),            # packed alpha
            pl.BlockSpec((tbp, rpl), lambda i: (i, 0)),          # packed kl
        ),
        compiler_params=pltpu.CompilerParams(
            dimension_semantics=("parallel",)),
    )(kl_const, p_packed, seg, seg_t, c_packed, g_packed)

    alpha = alpha_packed.reshape(b_pack * rpl, K)[:B]
    kl = kl_packed.reshape(b_pack * rpl, 1)[:B]
    if return_kl:
        return alpha, kl
    return alpha


# ------------------------------------ main ------------------------------------
if __name__ == "__main__":
    N, K, B = 10, 16, 8

    key = jax.random.PRNGKey(0)
    k_w, k_idx, k_gamma = jax.random.split(key, 3)

    # Module __init__ zero-inits logc.weight (-> c == 1, KL == 0).  Use a small
    # deterministic non-zero init instead so the KL path is numerically exercised.
    logc_weight = 0.3 * jax.random.normal(k_w, (N, K), dtype=jnp.float32)
    prior_a = jnp.ones((1, K), dtype=jnp.float32)
    idx = jax.random.randint(k_idx, (B,), 0, N)

    alpha, kl = label_mixer_forward(idx, logc_weight, prior_a, k_gamma)
    jax.block_until_ready((alpha, kl))

    # ---- reference check (pure JAX) ----
    c_ref = jnp.exp(logc_weight[idx])
    g_ref = jax.random.gamma(k_gamma, c_ref).astype(jnp.float32)
    alpha_ref = g_ref / jnp.sum(g_ref, axis=-1, keepdims=True)

    qsum = jnp.sum(c_ref, -1, keepdims=True)
    psum = jnp.sum(prior_a, -1, keepdims=True)
    kl_ref = (jsp_gammaln(qsum) - jsp_gammaln(psum)
              + jnp.sum(jsp_gammaln(prior_a) - jsp_gammaln(c_ref), -1, keepdims=True)
              + jnp.sum((c_ref - prior_a) * (jsp_digamma(c_ref) - jsp_digamma(qsum)),
                        -1, keepdims=True))

    assert alpha.shape == (B, K) and kl.shape == (B, 1)
    assert jnp.allclose(jnp.sum(alpha, axis=-1), 1.0, atol=1e-5)
    assert jnp.allclose(alpha, alpha_ref, atol=1e-5, rtol=1e-5)
    assert jnp.allclose(kl, kl_ref, atol=1e-4, rtol=1e-4)

    print("KERNEL_OK")
</pallas_src>

<mosaic_0001>
module attributes {stable_mosaic.version = 11 : i64} {
  func.func @_label_mixer_kernel(%arg0: i32, %arg1: memref<1x1xf32, #tpu.memory_space<smem>>, %arg2: memref<1x128xf32, #tpu.memory_space<vmem>>, %arg3: memref<128x8xf32, #tpu.memory_space<vmem>>, %arg4: memref<8x128xf32, #tpu.memory_space<vmem>>, %arg5: memref<1x128xf32, #tpu.memory_space<vmem>>, %arg6: memref<1x128xf32, #tpu.memory_space<vmem>>, %arg7: memref<1x128xf32, #tpu.memory_space<vmem>>, %arg8: memref<1x8xf32, #tpu.memory_space<vmem>>) attributes {dimension_semantics = [#tpu.dimension_semantics<parallel>], iteration_bounds = array<i64: 1>, scalar_prefetch = 0 : i64, scratch_operands = 0 : i64, tpu.core_type = #tpu.core_type<tc>, window_params = [{transform_indices = @transform_0, window_bounds = array<i64: 1, 1>}, {pipeline_mode = #tpu.pipeline_mode<synchronous>, transform_indices = @transform_1, window_bounds = array<i64: 1, 128>}, {pipeline_mode = #tpu.pipeline_mode<synchronous>, transform_indices = @transform_2, window_bounds = array<i64: 128, 8>}, {pipeline_mode = #tpu.pipeline_mode<synchronous>, transform_indices = @transform_3, window_bounds = array<i64: 8, 128>}, {transform_indices = @transform_4, window_bounds = array<i64: 1, 128>}, {transform_indices = @transform_5, window_bounds = array<i64: 1, 128>}, {transform_indices = @transform_6, window_bounds = array<i64: 1, 128>}, {transform_indices = @transform_7, window_bounds = array<i64: 1, 8>}]} {
    %c0 = arith.constant 0 : index
    %c0_0 = arith.constant 0 : index
    %0 = vector.load %arg5[%c0, %c0_0] : memref<1x128xf32, #tpu.memory_space<vmem>>, vector<1x128xf32>
    %c0_1 = arith.constant 0 : index
    %c0_2 = arith.constant 0 : index
    %1 = vector.load %arg6[%c0_1, %c0_2] : memref<1x128xf32, #tpu.memory_space<vmem>>, vector<1x128xf32>
    %c0_3 = arith.constant 0 : index
    %c0_4 = arith.constant 0 : index
    %2 = vector.load %arg2[%c0_3, %c0_4] : memref<1x128xf32, #tpu.memory_space<vmem>>, vector<1x128xf32>
    %c0_5 = arith.constant 0 : index
    %c0_6 = arith.constant 0 : index
    %3 = vector.load %arg3[%c0_5, %c0_6] : memref<128x8xf32, #tpu.memory_space<vmem>>, vector<128x8xf32>
    %c0_7 = arith.constant 0 : index
    %c0_8 = arith.constant 0 : index
    %4 = vector.load %arg4[%c0_7, %c0_8] : memref<8x128xf32, #tpu.memory_space<vmem>>, vector<8x128xf32>
    %c0_9 = arith.constant 0 : index
    %c0_10 = arith.constant 0 : index
    %5 = memref.load %arg1[%c0_9, %c0_10] : memref<1x1xf32, #tpu.memory_space<smem>>
    %cst = arith.constant dense<0.000000e+00> : vector<1x8xf32>
    %6 = tpu.matmul %1, %3, %cst {dimension_numbers = #tpu.dot_dimension_numbers<[1], [0], [0], [1], [0, 0, 1, 1], [], []>, precision = #tpu.contract_precision<fp32>} : vector<1x128xf32>, vector<128x8xf32>, vector<1x8xf32> -> vector<1x8xf32>
    %cst_11 = arith.constant 1.000000e+00 : f32
    %7 = vector.broadcast %cst_11 : f32 to vector<1x8xf32>
    %8 = arith.divf %7, %6 : vector<1x8xf32>
    %cst_12 = arith.constant dense<0.000000e+00> : vector<1x128xf32>
    %9 = tpu.matmul %8, %4, %cst_12 {dimension_numbers = #tpu.dot_dimension_numbers<[1], [0], [0], [1], [0, 0, 1, 1], [], []>, precision = #tpu.contract_precision<fp32>} : vector<1x8xf32>, vector<8x128xf32>, vector<1x128xf32> -> vector<1x128xf32>
    %10 = arith.mulf %1, %9 : vector<1x128xf32>
    %c0_13 = arith.constant 0 : index
    %c0_14 = arith.constant 0 : index
    %11 = vector.load %arg7[%c0_13, %c0_14] : memref<1x128xf32, #tpu.memory_space<vmem>>, vector<1x128xf32>
    tpu.vector_store %arg7[%c0_13, %c0_14], %10 {strides = array<i32>} : memref<1x128xf32, #tpu.memory_space<vmem>>, vector<1x128xf32>,
    %cst_15 = arith.constant dense<0.000000e+00> : vector<1x8xf32>
    %12 = tpu.matmul %0, %3, %cst_15 {dimension_numbers = #tpu.dot_dimension_numbers<[1], [0], [0], [1], [0, 0, 1, 1], [], []>, precision = #tpu.contract_precision<fp32>} : vector<1x128xf32>, vector<128x8xf32>, vector<1x8xf32> -> vector<1x8xf32>
    %cst_16 = arith.constant 1.000000e+00 : f32
    %13 = vector.broadcast %cst_16 : f32 to vector<1x128xf32>
    %14 = arith.addf %0, %13 : vector<1x128xf32>
    %cst_17 = arith.constant 2.000000e+00 : f32
    %15 = vector.broadcast %cst_17 : f32 to vector<1x128xf32>
    %16 = arith.addf %0, %15 : vector<1x128xf32>
    %cst_18 = arith.constant 3.000000e+00 : f32
    %17 = vector.broadcast %cst_18 : f32 to vector<1x128xf32>
    %18 = arith.addf %0, %17 : vector<1x128xf32>
    %cst_19 = arith.constant 4.000000e+00 : f32
    %19 = vector.broadcast %cst_19 : f32 to vector<1x128xf32>
    %20 = arith.addf %0, %19 : vector<1x128xf32>
    %cst_20 = arith.constant 5.000000e+00 : f32
    %21 = vector.broadcast %cst_20 : f32 to vector<1x128xf32>
    %22 = arith.addf %0, %21 : vector<1x128xf32>
    %cst_21 = arith.constant 6.000000e+00 : f32
    %23 = vector.broadcast %cst_21 : f32 to vector<1x128xf32>
    %24 = arith.addf %0, %23 : vector<1x128xf32>
    %cst_22 = arith.constant 7.000000e+00 : f32
    %25 = vector.broadcast %cst_22 : f32 to vector<1x128xf32>
    %26 = arith.addf %0, %25 : vector<1x128xf32>
    %27 = arith.mulf %0, %14 : vector<1x128xf32>
    %28 = arith.addf %0, %14 : vector<1x128xf32>
    %29 = arith.mulf %16, %18 : vector<1x128xf32>
    %30 = arith.addf %16, %18 : vector<1x128xf32>
    %31 = arith.mulf %20, %22 : vector<1x128xf32>
    %32 = arith.addf %20, %22 : vector<1x128xf32>
    %33 = arith.mulf %24, %26 : vector<1x128xf32>
    %34 = arith.addf %24, %26 : vector<1x128xf32>
    %35 = arith.mulf %27, %29 : vector<1x128xf32>
    %36 = arith.mulf %31, %33 : vector<1x128xf32>
    %37 = arith.mulf %28, %29 : vector<1x128xf32>
    %38 = arith.mulf %30, %27 : vector<1x128xf32>
    %39 = arith.addf %37, %38 : vector<1x128xf32>
    %40 = arith.mulf %32, %33 : vector<1x128xf32>
    %41 = arith.mulf %34, %31 : vector<1x128xf32>
    %42 = arith.addf %40, %41 : vector<1x128xf32>
    %43 = arith.mulf %35, %36 : vector<1x128xf32>
    %44 = math.log %43 : vector<1x128xf32>
    %45 = arith.mulf %39, %36 : vector<1x128xf32>
    %46 = arith.mulf %42, %35 : vector<1x128xf32>
    %47 = arith.addf %45, %46 : vector<1x128xf32>
    %48 = arith.divf %47, %43 : vector<1x128xf32>
    %cst_23 = arith.constant 8.000000e+00 : f32
    %49 = vector.broadcast %cst_23 : f32 to vector<1x128xf32>
    %50 = arith.addf %0, %49 : vector<1x128xf32>
    %51 = math.log %50 : vector<1x128xf32>
    %cst_24 = arith.constant 1.000000e+00 : f32
    %52 = vector.broadcast %cst_24 : f32 to vector<1x128xf32>
    %53 = arith.divf %52, %50 : vector<1x128xf32>
    %54 = arith.mulf %53, %53 : vector<1x128xf32>
    %cst_25 = arith.constant 5.000000e-01 : f32
    %55 = vector.broadcast %cst_25 : f32 to vector<1x128xf32>
    %56 = arith.subf %50, %55 : vector<1x128xf32>
    %57 = arith.mulf %56, %51 : vector<1x128xf32>
    %58 = arith.subf %57, %50 : vector<1x128xf32>
    %cst_26 = arith.constant 0.918938517 : f32
    %59 = vector.broadcast %cst_26 : f32 to vector<1x128xf32>
    %60 = arith.addf %58, %59 : vector<1x128xf32>
    %61 = arith.subf %60, %44 : vector<1x128xf32>
    %cst_27 = arith.constant -5.95238118E-4 : f32
    %62 = vector.broadcast %cst_27 : f32 to vector<1x128xf32>
    %63 = arith.mulf %54, %62 : vector<1x128xf32>
    %cst_28 = arith.constant 7.93650805E-4 : f32
    %64 = vector.broadcast %cst_28 : f32 to vector<1x128xf32>
    %65 = arith.addf %64, %63 : vector<1x128xf32>
    %66 = arith.mulf %54, %65 : vector<1x128xf32>
    %cst_29 = arith.constant -0.00277777785 : f32
    %67 = vector.broadcast %cst_29 : f32 to vector<1x128xf32>
    %68 = arith.addf %67, %66 : vector<1x128xf32>
    %69 = arith.mulf %54, %68 : vector<1x128xf32>
    %cst_30 = arith.constant 0.0833333358 : f32
    %70 = vector.broadcast %cst_30 : f32 to vector<1x128xf32>
    %71 = arith.addf %70, %69 : vector<1x128xf32>
    %72 = arith.mulf %53, %71 : vector<1x128xf32>
    %73 = arith.addf %61, %72 : vector<1x128xf32>
    %cst_31 = arith.constant 5.000000e-01 : f32
    %74 = vector.broadcast %cst_31 : f32 to vector<1x128xf32>
    %75 = arith.mulf %74, %53 : vector<1x128xf32>
    %76 = arith.subf %51, %75 : vector<1x128xf32>
    %77 = arith.subf %76, %48 : vector<1x128xf32>
    %cst_32 = arith.constant 0.0039682542 : f32
    %78 = vector.broadcast %cst_32 : f32 to vector<1x128xf32>
    %79 = arith.mulf %54, %78 : vector<1x128xf32>
    %cst_33 = arith.constant 0.00833333377 : f32
    %80 = vector.broadcast %cst_33 : f32 to vector<1x128xf32>
    %81 = arith.subf %80, %79 : vector<1x128xf32>
    %82 = arith.mulf %54, %81 : vector<1x128xf32>
    %cst_34 = arith.constant 0.0833333358 : f32
    %83 = vector.broadcast %cst_34 : f32 to vector<1x128xf32>
    %84 = arith.subf %83, %82 : vector<1x128xf32>
    %85 = arith.mulf %54, %84 : vector<1x128xf32>
    %86 = arith.subf %77, %85 : vector<1x128xf32>
    %cst_35 = arith.constant 1.000000e+00 : f32
    %87 = vector.broadcast %cst_35 : f32 to vector<1x8xf32>
    %88 = arith.addf %12, %87 : vector<1x8xf32>
    %cst_36 = arith.constant 2.000000e+00 : f32
    %89 = vector.broadcast %cst_36 : f32 to vector<1x8xf32>
    %90 = arith.addf %12, %89 : vector<1x8xf32>
    %cst_37 = arith.constant 3.000000e+00 : f32
    %91 = vector.broadcast %cst_37 : f32 to vector<1x8xf32>
    %92 = arith.addf %12, %91 : vector<1x8xf32>
    %cst_38 = arith.constant 4.000000e+00 : f32
    %93 = vector.broadcast %cst_38 : f32 to vector<1x8xf32>
    %94 = arith.addf %12, %93 : vector<1x8xf32>
    %cst_39 = arith.constant 5.000000e+00 : f32
    %95 = vector.broadcast %cst_39 : f32 to vector<1x8xf32>
    %96 = arith.addf %12, %95 : vector<1x8xf32>
    %cst_40 = arith.constant 6.000000e+00 : f32
    %97 = vector.broadcast %cst_40 : f32 to vector<1x8xf32>
    %98 = arith.addf %12, %97 : vector<1x8xf32>
    %cst_41 = arith.constant 7.000000e+00 : f32
    %99 = vector.broadcast %cst_41 : f32 to vector<1x8xf32>
    %100 = arith.addf %12, %99 : vector<1x8xf32>
    %101 = arith.mulf %12, %88 : vector<1x8xf32>
    %102 = arith.addf %12, %88 : vector<1x8xf32>
    %103 = arith.mulf %90, %92 : vector<1x8xf32>
    %104 = arith.addf %90, %92 : vector<1x8xf32>
    %105 = arith.mulf %94, %96 : vector<1x8xf32>
    %106 = arith.addf %94, %96 : vector<1x8xf32>
    %107 = arith.mulf %98, %100 : vector<1x8xf32>
    %108 = arith.addf %98, %100 : vector<1x8xf32>
    %109 = arith.mulf %101, %103 : vector<1x8xf32>
    %110 = arith.mulf %105, %107 : vector<1x8xf32>
    %111 = arith.mulf %102, %103 : vector<1x8xf32>
    %112 = arith.mulf %104, %101 : vector<1x8xf32>
    %113 = arith.addf %111, %112 : vector<1x8xf32>
    %114 = arith.mulf %106, %107 : vector<1x8xf32>
    %115 = arith.mulf %108, %105 : vector<1x8xf32>
    %116 = arith.addf %114, %115 : vector<1x8xf32>
    %117 = arith.mulf %109, %110 : vector<1x8xf32>
    %118 = math.log %117 : vector<1x8xf32>
    %119 = arith.mulf %113, %110 : vector<1x8xf32>
    %120 = arith.mulf %116, %109 : vector<1x8xf32>
    %121 = arith.addf %119, %120 : vector<1x8xf32>
    %122 = arith.divf %121, %117 : vector<1x8xf32>
    %cst_42 = arith.constant 8.000000e+00 : f32
    %123 = vector.broadcast %cst_42 : f32 to vector<1x8xf32>
    %124 = arith.addf %12, %123 : vector<1x8xf32>
    %125 = math.log %124 : vector<1x8xf32>
    %cst_43 = arith.constant 1.000000e+00 : f32
    %126 = vector.broadcast %cst_43 : f32 to vector<1x8xf32>
    %127 = arith.divf %126, %124 : vector<1x8xf32>
    %128 = arith.mulf %127, %127 : vector<1x8xf32>
    %cst_44 = arith.constant 5.000000e-01 : f32
    %129 = vector.broadcast %cst_44 : f32 to vector<1x8xf32>
    %130 = arith.subf %124, %129 : vector<1x8xf32>
    %131 = arith.mulf %130, %125 : vector<1x8xf32>
    %132 = arith.subf %131, %124 : vector<1x8xf32>
    %cst_45 = arith.constant 0.918938517 : f32
    %133 = vector.broadcast %cst_45 : f32 to vector<1x8xf32>
    %134 = arith.addf %132, %133 : vector<1x8xf32>
    %135 = arith.subf %134, %118 : vector<1x8xf32>
    %cst_46 = arith.constant -5.95238118E-4 : f32
    %136 = vector.broadcast %cst_46 : f32 to vector<1x8xf32>
    %137 = arith.mulf %128, %136 : vector<1x8xf32>
    %cst_47 = arith.constant 7.93650805E-4 : f32
    %138 = vector.broadcast %cst_47 : f32 to vector<1x8xf32>
    %139 = arith.addf %138, %137 : vector<1x8xf32>
    %140 = arith.mulf %128, %139 : vector<1x8xf32>
    %cst_48 = arith.constant -0.00277777785 : f32
    %141 = vector.broadcast %cst_48 : f32 to vector<1x8xf32>
    %142 = arith.addf %141, %140 : vector<1x8xf32>
    %143 = arith.mulf %128, %142 : vector<1x8xf32>
    %cst_49 = arith.constant 0.0833333358 : f32
    %144 = vector.broadcast %cst_49 : f32 to vector<1x8xf32>
    %145 = arith.addf %144, %143 : vector<1x8xf32>
    %146 = arith.mulf %127, %145 : vector<1x8xf32>
    %147 = arith.addf %135, %146 : vector<1x8xf32>
    %cst_50 = arith.constant 5.000000e-01 : f32
    %148 = vector.broadcast %cst_50 : f32 to vector<1x8xf32>
    %149 = arith.mulf %148, %127 : vector<1x8xf32>
    %150 = arith.subf %125, %149 : vector<1x8xf32>
    %151 = arith.subf %150, %122 : vector<1x8xf32>
    %cst_51 = arith.constant 0.0039682542 : f32
    %152 = vector.broadcast %cst_51 : f32 to vector<1x8xf32>
    %153 = arith.mulf %128, %152 : vector<1x8xf32>
    %cst_52 = arith.constant 0.00833333377 : f32
    %154 = vector.broadcast %cst_52 : f32 to vector<1x8xf32>
    %155 = arith.subf %154, %153 : vector<1x8xf32>
    %156 = arith.mulf %128, %155 : vector<1x8xf32>
    %cst_53 = arith.constant 0.0833333358 : f32
    %157 = vector.broadcast %cst_53 : f32 to vector<1x8xf32>
    %158 = arith.subf %157, %156 : vector<1x8xf32>
    %159 = arith.mulf %128, %158 : vector<1x8xf32>
    %160 = arith.subf %151, %159 : vector<1x8xf32>
    %161 = arith.subf %0, %2 : vector<1x128xf32>
    %cst_54 = arith.constant dense<0.000000e+00> : vector<1x128xf32>
    %162 = tpu.matmul %160, %4, %cst_54 {dimension_numbers = #tpu.dot_dimension_numbers<[1], [0], [0], [1], [0, 0, 1, 1], [], []>, precision = #tpu.contract_precision<fp32>} : vector<1x8xf32>, vector<8x128xf32>, vector<1x128xf32> -> vector<1x128xf32>
    %163 = arith.subf %86, %162 : vector<1x128xf32>
    %164 = arith.mulf %161, %163 : vector<1x128xf32>
    %165 = arith.subf %164, %73 : vector<1x128xf32>
    %166 = vector.broadcast %5 : f32 to vector<1x8xf32>
    %167 = arith.addf %147, %166 : vector<1x8xf32>
    %cst_55 = arith.constant dense<0.000000e+00> : vector<1x8xf32>
    %168 = tpu.matmul %165, %3, %cst_55 {dimension_numbers = #tpu.dot_dimension_numbers<[1], [0], [0], [1], [0, 0, 1, 1], [], []>, precision = #tpu.contract_precision<fp32>} : vector<1x128xf32>, vector<128x8xf32>, vector<1x8xf32> -> vector<1x8xf32>
    %169 = arith.addf %167, %168 : vector<1x8xf32>
    %c0_56 = arith.constant 0 : index
    %c0_57 = arith.constant 0 : index
    %170 = vector.load %arg8[%c0_56, %c0_57] : memref<1x8xf32, #tpu.memory_space<vmem>>, vector<1x8xf32>
    tpu.vector_store %arg8[%c0_56, %c0_57], %169 {strides = array<i32>} : memref<1x8xf32, #tpu.memory_space<vmem>>, vector<1x8xf32>,
    return
  }
  func.func @transform_0(%arg0: i32) -> (i32, i32) {
    %c0_i32 = arith.constant 0 : i32
    %c0_i32_0 = arith.constant 0 : i32
    %c0_i32_1 = arith.constant 0 : i32
    return %c0_i32, %c0_i32_0 : i32, i32
  }
  func.func @transform_1(%arg0: i32) -> (i32, i32) {
    %c0_i32 = arith.constant 0 : i32
    %c0_i32_0 = arith.constant 0 : i32
    %c0_i32_1 = arith.constant 0 : i32
    return %c0_i32, %c0_i32_0 : i32, i32
  }
  func.func @transform_2(%arg0: i32) -> (i32, i32) {
    %c0_i32 = arith.constant 0 : i32
    %c0_i32_0 = arith.constant 0 : i32
    %c0_i32_1 = arith.constant 0 : i32
    return %c0_i32, %c0_i32_0 : i32, i32
  }
  func.func @transform_3(%arg0: i32) -> (i32, i32) {
    %c0_i32 = arith.constant 0 : i32
    %c0_i32_0 = arith.constant 0 : i32
    %c0_i32_1 = arith.constant 0 : i32
    return %c0_i32, %c0_i32_0 : i32, i32
  }
  func.func @transform_4(%arg0: i32) -> (i32, i32) {
    %c0_i32 = arith.constant 0 : i32
    %c0_i32_0 = arith.constant 0 : i32
    return %arg0, %c0_i32 : i32, i32
  }
  func.func @transform_5(%arg0: i32) -> (i32, i32) {
    %c0_i32 = arith.constant 0 : i32
    %c0_i32_0 = arith.constant 0 : i32
    return %arg0, %c0_i32 : i32, i32
  }
  func.func @transform_6(%arg0: i32) -> (i32, i32) {
    %c0_i32 = arith.constant 0 : i32
    %c0_i32_0 = arith.constant 0 : i32
    return %arg0, %c0_i32 : i32, i32
  }
  func.func @transform_7(%arg0: i32) -> (i32, i32) {
    %c0_i32 = arith.constant 0 : i32
    %c0_i32_0 = arith.constant 0 : i32
    return %arg0, %c0_i32 : i32, i32
  }
}

</mosaic_0001>

<bundles_post_ra>
// kernel: tpu_custom_call.1
= control target key start
LH: loop header
LB: loop body
LE: loop exit
PB: predicated region body
PF: predicated region fallthrough
CT: control target
= control target key end

     0   :  { %14 = vsyncpa [#allocation4], 0  ;;  %v5320_v3 = vmov 0.0|0.0   ;;  %vm4596_vm0 = vmmov 0   ;;  %v5322_v8 = vmov 0.0   ;;  %s5312_s0 = inlined_call_operand.<no memory space> [shape: f32[1,1], index: 0, kind: input, shape index: {}]   ;;  %s5313_s1 = inlined_call_operand.vmem [shape: f32[1,128], index: 1, kind: input, shape index: {}]   ;;  %s5314_s2 = inlined_call_operand.vmem [shape: f32[128,8], index: 2, kind: input, shape index: {}]   ;;  %s5315_s3 = inlined_call_operand.vmem [shape: f32[8,128], index: 3, kind: input, shape index: {}]   ;;  %s5316_s4 = inlined_call_operand.vmem [shape: f32[1,128], index: 4, kind: input, shape index: {}]   ;;  %s5317_s5 = inlined_call_operand.vmem [shape: f32[1,128], index: 5, kind: input, shape index: {}]   ;;  %s5318_s6 = inlined_call_operand.hbm [shape: f32[1,128], index: 6, kind: output, shape index: {0}]   ;;  %s5319_s7 = inlined_call_operand.hbm [shape: f32[1,8], index: 7, kind: output, shape index: {1}]  }
   0x1   :  { %v31_v0 = vld [vmem:[%s5314_s2] sm:$0xff]  ;;  %v32_v1 = vld [vmem:[%s5314_s2 + $0x8] sm:$0xff]  ;;  %v33_v2 = vld [vmem:[%s5314_s2 + $0x10] sm:$0xff]  ;;  %4052 = vmatprep.subr.bf16.mxu0 %v5320_v3  ;;  %3394 = vmatprep.mubr.msk.f32.mxu0 %vm4596_vm0, %v5322_v8 }
   0x2   :  { %v50_v4 = vand.u32 4294901760, %v31_v0  ;;  %v53_v5 = vand.u32 4294901760, %v32_v1  ;;  %v34_v6 = vld [vmem:[%s5314_s2 + $0x18] sm:$0xff]  ;;  %v56_v7 = vand.u32 4294901760, %v33_v2  ;;  %v35_v10 = vld [vmem:[%s5314_s2 + $0x20] sm:$0xff]  ;;  %v36_v11 = vld [vmem:[%s5314_s2 + $0x28] sm:$0xff]  ;;  %3572 = vmatprep.subr.mxu1 %v5322_v8  ;;  %3574 = vmatprep.mubr.msk.f32.mxu1 %vm4596_vm0, %v5322_v8 }
   0x3   :  { %v59_v9 = vand.u32 4294901760, %v34_v6  ;;  %v62_v14 = vand.u32 4294901760, %v35_v10  ;;  %v65_v15 = vand.u32 4294901760, %v36_v11  ;;  %v37_v16 = vld [vmem:[%s5314_s2 + $0x30] sm:$0xff]  ;;  %v38_v17 = vld [vmem:[%s5314_s2 + $0x38] sm:$0xff] }
   0x4   :  { %v4664_v12 = vpack.c.bf16 %v53_v5, %v50_v4 }
   0x5   :  { %v4667_v13 = vpack.c.bf16 %v59_v9, %v56_v7 }
   0x6   :  { %4054 = vmatpush3.bf16.msra.mxu0 %v4664_v12 }
   0x7   :  { %4055 = vmatprep.subr.bf16.mxu0 %v5320_v3 }
   0x8   :  { %15 = vsyncpa [#allocation6], 0  ;;  %v4677_v18 = vpack.c.bf16 %v65_v15, %v62_v14  ;;  %v68_v19 = vand.u32 4294901760, %v37_v16  ;;  %v71_v20 = vand.u32 4294901760, %v38_v17  ;;  %v39_v21 = vld [vmem:[%s5314_s2 + $0x40] sm:$0xff]  ;;  %v40_v23 = vld [vmem:[%s5314_s2 + $0x48] sm:$0xff]  ;;  %v4715_v34 = vsub.f32 %v31_v0, %v50_v4 }
   0x9   :  { %v4685_v22 = vld [vmem:[%s5317_s5] sm:$0x1]  ;;  %v41_v24 = vld [vmem:[%s5314_s2 + $0x50] sm:$0xff]  ;;  %v42_v25 = vld [vmem:[%s5314_s2 + $0x58] sm:$0xff]  ;;  %v74_v27 = vand.u32 4294901760, %v39_v21  ;;  %v77_v33 = vand.u32 4294901760, %v40_v23  ;;  %v4717_v35 = vsub.f32 %v32_v1, %v53_v5  ;;  %v4724_v43 = vsub.f32 %v33_v2, %v56_v7 }
   0xa   :  { %4057 = vmatpush3.bf16.msra.mxu0 %v4667_v13  ;;  %v43_v26 = vld [vmem:[%s5314_s2 + $0x60] sm:$0xff]  ;;  %v44_v28 = vld [vmem:[%s5314_s2 + $0x68] sm:$0xff]  ;;  %v45_v29 = vld [vmem:[%s5314_s2 + $0x70] sm:$0xff]  ;;  %v4710_v31 = vand.u32 4294901760, %v4685_v22  ;;  %v4713_v32 = vpack.c.bf16 %v71_v20, %v68_v19  ;;  %v80_v36 = vand.u32 4294901760, %v41_v24  ;;  %v83_v37 = vand.u32 4294901760, %v42_v25 }
   0xb   :  { %4058 = vmatprep.subr.bf16.mxu0 %v5320_v3  ;;  %v46_v30 = vld [vmem:[%s5314_s2 + $0x78] sm:$0xff]  ;;  %v86_v38 = vand.u32 4294901760, %v43_v26  ;;  %v89_v39 = vand.u32 4294901760, %v44_v28  ;;  %v92_v40 = vand.u32 4294901760, %v45_v29  ;;  %v4726_v44 = vsub.f32 %v34_v6, %v59_v9 }
   0xc   :  { %v95_v41 = vand.u32 4294901760, %v46_v30  ;;  %v4722_v42 = vsub.f32 %v4685_v22, %v4710_v31  ;;  %v4729_v45 = vpack.c.bf16 %v77_v33, %v74_v27  ;;  %v143_v46 = vand.u32 4294901760, %v4715_v34 }
   0xd   :  { %v150_v47 = vand.u32 4294901760, %v4717_v35  ;;  %v4733_v48 = vsub.f32 %v35_v10, %v62_v14  ;;  %v4736_v49 = vpack.c.bf16 %v83_v37, %v80_v36  ;;  %v4738_v50 = vpack.c.bf16 %v89_v39, %v86_v38 }
   0xe   :  { %4060 = vmatpush3.bf16.msra.mxu0 %v4677_v18  ;;  %v4740_v51 = vpack.c.bf16 %v95_v41, %v92_v40  ;;  %v132_v52 = vand.u32 4294901760, %v4722_v42  ;;  %v157_v53 = vand.u32 4294901760, %v4724_v43  ;;  %v164_v54 = vand.u32 4294901760, %v4726_v44 }
   0xf   :  { %4061 = vmatprep.subr.bf16.mxu0 %v5320_v3  ;;  %v4745_v55 = vsub.f32 %v36_v11, %v65_v15  ;;  %v144_v56 = vsub.f32 %v4715_v34, %v143_v46  ;;  %v151_v57 = vsub.f32 %v4717_v35, %v150_v47  ;;  %v171_v58 = vand.u32 4294901760, %v4733_v48 }
  0x10   :  { %v4751_v59 = vsub.f32 %v37_v16, %v68_v19  ;;  %v4754_v60 = vsub.f32 %v38_v17, %v71_v20  ;;  %v4756_v61 = vsub.f32 %v39_v21, %v74_v27  ;;  %v4758_v62 = vsub.f32 %v40_v23, %v77_v33 }
  0x11   :  { %v4760_v63 = vsub.f32 %v41_v24, %v80_v36  ;;  %v4762_v0 = vsub.f32 %v42_v25, %v83_v37  ;;  %v4764_v1 = vsub.f32 %v43_v26, %v86_v38  ;;  %v4766_v2 = vsub.f32 %v44_v28, %v89_v39 }
  0x12   :  { %4063 = vmatpush3.bf16.msra.mxu0 %v4713_v32  ;;  %v4768_v4 = vsub.f32 %v45_v29, %v92_v40  ;;  %v133_v5 = vsub.f32 %v4722_v42, %v132_v52  ;;  %v158_v6 = vsub.f32 %v4724_v43, %v157_v53  ;;  %v178_v7 = vand.u32 4294901760, %v4745_v55 }
  0x13   :  { %4064 = vmatprep.subr.bf16.mxu0 %v5320_v3  ;;  %v4775_v9 = vsub.f32 %v46_v30, %v95_v41  ;;  %v145_v10 = vand.u32 4294901760, %v144_v56  ;;  %v152_v11 = vand.u32 4294901760, %v151_v57  ;;  %v165_v14 = vsub.f32 %v4726_v44, %v164_v54 }
  0x14   :  { %v185_v15 = vand.u32 4294901760, %v4751_v59  ;;  %v192_v16 = vand.u32 4294901760, %v4754_v60  ;;  %v199_v17 = vand.u32 4294901760, %v4756_v61  ;;  %v206_v19 = vand.u32 4294901760, %v4758_v62 }
  0x15   :  { %v213_v20 = vand.u32 4294901760, %v4760_v63  ;;  %v220_v21 = vand.u32 4294901760, %v4762_v0  ;;  %v227_v23 = vand.u32 4294901760, %v4764_v1  ;;  %v234_v24 = vand.u32 4294901760, %v4766_v2 }
  0x16   :  { %4066 = vmatpush3.bf16.msra.mxu0 %v4729_v45  ;;  %v241_v25 = vand.u32 4294901760, %v4768_v4  ;;  %v248_v26 = vand.u32 4294901760, %v4775_v9  ;;  %v4790_v27 = vpack.c.bf16 %v150_v47, %v143_v46  ;;  %v4792_v28 = vpack.c.bf16 %v164_v54, %v157_v53 }
  0x17   :  { %4067 = vmatprep.subr.bf16.mxu0 %v5320_v3  ;;  %v4794_v29 = vpack.c.bf16 %v178_v7, %v171_v58  ;;  %v4797_v30 = vpack.c.bf16 %v192_v16, %v185_v15  ;;  %v4799_v33 = vpack.c.bf16 %v206_v19, %v199_v17  ;;  %v4801_v36 = vpack.c.bf16 %v220_v21, %v213_v20 }
  0x18   :  { %v4803_v37 = vpack.c.bf16 %v234_v24, %v227_v23  ;;  %v4806_v38 = vpack.c.bf16 %v248_v26, %v241_v25  ;;  %v134_v39 = vand.u32 4294901760, %v133_v5  ;;  %v172_v40 = vsub.f32 %v4733_v48, %v171_v58 }
  0x19   :  { %5327 = vst [vmem:[#allocation9_spill] sm:$0xff] %v4801_v36  ;;  %v4810_v41 = vpack.c.bf16 %v152_v11, %v145_v10  ;;  %v159_v46 = vand.u32 4294901760, %v158_v6  ;;  %v166_v47 = vand.u32 4294901760, %v165_v14  ;;  %v179_v53 = vsub.f32 %v4745_v55, %v178_v7 }
  0x1a   :  { %4069 = vmatpush3.bf16.msra.mxu0 %v4736_v49  ;;  %5328 = vst [vmem:[#allocation10_spill] sm:$0xff] %v4803_v37  ;;  %5329 = vst [vmem:[#allocation11_spill] sm:$0xff] %v4806_v38  ;;  %v186_v54 = vsub.f32 %v4751_v59, %v185_v15  ;;  %v173_v57 = vand.u32 4294901760, %v172_v40  ;;  %v193_v58 = vsub.f32 %v4754_v60, %v192_v16  ;;  %vm692_vm1 = vcmask 64512  }
  0x1b   :  { %4070 = vmatprep.subr.bf16.mxu0 %v5320_v3  ;;  %v4816_v56 = vpack.c.bf16 %v166_v47, %v159_v46  ;;  %v180_v5 = vand.u32 4294901760, %v179_v53  ;;  %v200_v11 = vsub.f32 %v4756_v61, %v199_v17  ;;  %v207_v14 = vsub.f32 %v4758_v62, %v206_v19 }
  0x1c   :  { %v187_v6 = vand.u32 4294901760, %v186_v54  ;;  %v194_v10 = vand.u32 4294901760, %v193_v58  ;;  %v214_v15 = vsub.f32 %v4760_v63, %v213_v20  ;;  %v221_v46 = vsub.f32 %v4762_v0, %v220_v21 }
  0x1d   :  { %v4823_v7 = vpack.c.bf16 %v180_v5, %v173_v57  ;;  %v208_v40 = vand.u32 4294901760, %v207_v14  ;;  %v228_v47 = vsub.f32 %v4764_v1, %v227_v23  ;;  %v235_v20 = vsub.f32 %v4766_v2, %v234_v24 }
  0x1e   :  { %4072 = vmatpush3.bf16.msra.mxu0 %v4738_v50  ;;  %v4830_v16 = vpack.c.bf16 %v194_v10, %v187_v6  ;;  %v215_v19 = vand.u32 4294901760, %v214_v15  ;;  %v222_v53 = vand.u32 4294901760, %v221_v46  ;;  %v242_v54 = vsub.f32 %v4768_v4, %v241_v25  ;;  %v5018_v15 = vld [vmem:[%s5316_s4] sm:$0x1] }
  0x1f   :  { %4073 = vmatprep.subr.bf16.mxu0 %v5320_v3  ;;  %v229_v21 = vand.u32 4294901760, %v228_v47  ;;  %v236_v5 = vand.u32 4294901760, %v235_v20  ;;  %v249_v23 = vsub.f32 %v4775_v9, %v248_v26  ;;  %v4857_v26 = vpack.c.bf16 %v4717_v35, %v4715_v34 }
  0x20   :  { %v4842_v57 = vpack.c.bf16 %v222_v53, %v215_v19  ;;  %v243_v6 = vand.u32 4294901760, %v242_v54  ;;  %v4864_v10 = vpack.c.bf16 %v4726_v44, %v4724_v43  ;;  %v4872_v34 = vpack.c.bf16 %v4745_v55, %v4733_v48 }
  0x21   :  { %v4847_v58 = vpack.c.bf16 %v236_v5, %v229_v21  ;;  %v250_v24 = vand.u32 4294901760, %v249_v23  ;;  %v4878_v35 = vpack.c.bf16 %v4754_v60, %v4751_v59  ;;  %v4884_v43 = vpack.c.bf16 %v4758_v62, %v4756_v61 }
  0x22   :  { %4075 = vmatpush3.bf16.msra.mxu0 %v4740_v51  ;;  %v4890_v44 = vpack.c.bf16 %v4762_v0, %v4760_v63  ;;  %v4896_v48 = vpack.c.bf16 %v4766_v2, %v4764_v1  ;;  %v4902_v55 = vpack.c.bf16 %v4775_v9, %v4768_v4 }
  0x23   :  { %4076 = vmatprep.subr.bf16.mxu0 %v5320_v3  ;;  %v4851_v25 = vpack.c.bf16 %v250_v24, %v243_v6 }
  0x25   :  { %3395 = vmatmul.mubr.f32.vlgmr.msra.gmra.mrb[0].mxu0 %v134_v39  ;;  %v201_v39 = vand.u32 4294901760, %v200_v11 }
  0x26   :  { %4078 = vmatpush3.bf16.msra.mxu0 %v4810_v41  ;;  %3429 = vmatprep.mubr.msk.f32.mxu0 %vm4596_vm0, %v5322_v8 }
  0x27   :  { %4079 = vmatprep.subr.bf16.mxu0 %v5320_v3  ;;  %v4836_v17 = vpack.c.bf16 %v208_v40, %v201_v39  ;;  %v5022_v39 = vand.u32 4294901760, %v5018_v15 }
  0x29   :  { %v5028_v40 = vsub.f32 %v5018_v15, %v5022_v39 }
  0x2a   :  { %4081 = vmatpush3.bf16.msra.mxu0 %v4816_v56 }
  0x2b   :  { %4082 = vmatprep.subr.bf16.mxu0 %v5320_v3  ;;  %v1227_v46 = vand.u32 4294901760, %v5028_v40 }
  0x2d   :  { %v1228_v47 = vsub.f32 %v5028_v40, %v1227_v46 }
  0x2e   :  { %4084 = vmatpush3.bf16.msra.mxu0 %v4823_v7 }
  0x2f   :  { %4085 = vmatprep.subr.bf16.mxu0 %v5320_v3  ;;  %v1229_v19 = vand.u32 4294901760, %v1228_v47 }
  0x32   :  { %4087 = vmatpush3.bf16.msra.mxu0 %v4830_v16 }
  0x33   :  { %4088 = vmatprep.subr.bf16.mxu0 %v5320_v3 }
  0x36   :  { %4090 = vmatpush3.bf16.msra.mxu0 %v4836_v17 }
  0x37   :  { %4091 = vmatprep.subr.bf16.mxu0 %v5320_v3 }
  0x3a   :  { %4093 = vmatpush3.bf16.msra.mxu0 %v4842_v57 }
  0x3b   :  { %4094 = vmatprep.subr.bf16.mxu0 %v5320_v3 }
  0x3e   :  { %4096 = vmatpush3.bf16.msra.mxu0 %v4847_v58 }
  0x3f   :  { %4097 = vmatprep.subr.bf16.mxu0 %v5320_v3 }
  0x42   :  { %4099 = vmatpush3.bf16.msra.mxu0 %v4851_v25 }
  0x43   :  { %4100 = vmatprep.subr.bf16.mxu0 %v5320_v3 }
  0x45   :  { %3430 = vmatmul.mubr.f32.vlgmr.msra.gmra.mrb[0].mxu0 %v4710_v31 }
  0x46   :  { %4102 = vmatpush3.bf16.msra.mxu0 %v4857_v26  ;;  %3464 = vmatprep.mubr.msk.f32.mxu0 %vm4596_vm0, %v5322_v8 }
  0x47   :  { %4103 = vmatprep.subr.bf16.mxu0 %v5320_v3 }
  0x4a   :  { %4105 = vmatpush3.bf16.msra.mxu0 %v4864_v10 }
  0x4b   :  { %4106 = vmatprep.subr.bf16.mxu0 %v5320_v3 }
  0x4e   :  { %4108 = vmatpush3.bf16.msra.mxu0 %v4872_v34 }
  0x4f   :  { %4109 = vmatprep.subr.bf16.mxu0 %v5320_v3 }
  0x52   :  { %4111 = vmatpush3.bf16.msra.mxu0 %v4878_v35 }
  0x53   :  { %4112 = vmatprep.subr.bf16.mxu0 %v5320_v3 }
  0x56   :  { %4114 = vmatpush3.bf16.msra.mxu0 %v4884_v43 }
  0x57   :  { %4115 = vmatprep.subr.bf16.mxu0 %v5320_v3 }
  0x5a   :  { %4117 = vmatpush3.bf16.msra.mxu0 %v4890_v44 }
  0x5b   :  { %4118 = vmatprep.subr.bf16.mxu0 %v5320_v3 }
  0x5e   :  { %4120 = vmatpush3.bf16.msra.mxu0 %v4896_v48 }
  0x5f   :  { %4121 = vmatprep.subr.bf16.mxu0 %v5320_v3 }
  0x62   :  { %4123 = vmatpush3.bf16.msra.mxu0 %v4902_v55 }
  0x63   :  { %4124 = vmatprep.subr.bf16.mxu0 %v5320_v3 }
  0x65   :  { %3465 = vmatmul.mubr.f32.vlgmr.msra.gmra.mrb[0].mxu0 %v4722_v42  ;;  %v47_v42 = vld [vmem:[%s5315_s3] sm:$0xff] }
  0x66   :  { %4126 = vmatpush3.bf16.msra.mxu0 %v4664_v12  ;;  %3499 = vmatprep.mubr.msk.f32.mxu0 %vm4596_vm0, %v5322_v8 }
  0x67   :  { %4127 = vmatprep.subr.bf16.mxu0 %v5320_v3 }
  0x6a   :  { %4129 = vmatpush3.bf16.msra.mxu0 %v4667_v13 }
  0x6b   :  { %4130 = vmatprep.subr.bf16.mxu0 %v5320_v3 }
  0x6e   :  { %4132 = vmatpush3.bf16.msra.mxu0 %v4677_v18 }
  0x6f   :  { %4133 = vmatprep.subr.bf16.mxu0 %v5320_v3 }
  0x72   :  { %4135 = vmatpush3.bf16.msra.mxu0 %v4713_v32 }
  0x73   :  { %4136 = vmatprep.subr.bf16.mxu0 %v5320_v3 }
  0x76   :  { %4138 = vmatpush3.bf16.msra.mxu0 %v4729_v45 }
  0x77   :  { %4139 = vmatprep.subr.bf16.mxu0 %v5320_v3 }
  0x7a   :  { %4141 = vmatpush3.bf16.msra.mxu0 %v4736_v49 }
  0x7b   :  { %4142 = vmatprep.subr.bf16.mxu0 %v5320_v3 }
  0x7e   :  { %4144 = vmatpush3.bf16.msra.mxu0 %v4738_v50 }
  0x7f   :  { %4145 = vmatprep.subr.bf16.mxu0 %v5320_v3 }
  0x82   :  { %4147 = vmatpush3.bf16.msra.mxu0 %v4740_v51 }
  0x83   :  { %4148 = vmatprep.subr.bf16.mxu0 %v5320_v3 }
  0x85   :  { %3500 = vmatmul.mubr.f32.vlgmr.msra.gmra.mrb[0].mxu0 %v132_v52  ;;  %v4971_v52 = vand.u32 4294901760, %v47_v42 }
  0x86   :  { %4150 = vmatpush3.bf16.msra.mxu0 %v4790_v27  ;;  %3534 = vmatprep.mubr.msk.f32.mxu0 %vm4596_vm0, %v5322_v8 }
  0x87   :  { %4151 = vmatprep.subr.bf16.mxu0 %v5320_v3  ;;  %3573 = vmatpush3.msra.mxu1 %v4971_v52  ;;  %v4978_v60 = vsub.f32 %v47_v42, %v4971_v52 }
  0x88   :  { %3577 = vmatprep.subr.mxu1 %v5322_v8 }
  0x89   :  { %v4982_v63 = vand.u32 4294901760, %v4978_v60 }
  0x8a   :  { %4153 = vmatpush3.bf16.msra.mxu0 %v4792_v28 }
  0x8b   :  { %4154 = vmatprep.subr.bf16.mxu0 %v5320_v3  ;;  %v776_v2 = vsub.f32 %v4978_v60, %v4982_v63 }
  0x8d   :  { %v4986_v11 = vand.u32 4294901760, %v776_v2 }
  0x8e   :  { %4156 = vmatpush3.bf16.msra.mxu0 %v4794_v29 }
  0x8f   :  { %4157 = vmatprep.subr.bf16.mxu0 %v5320_v3 }
  0x92   :  { %4159 = vmatpush3.bf16.msra.mxu0 %v4797_v30 }
  0x93   :  { %4160 = vmatprep.subr.bf16.mxu0 %v5320_v3 }
  0x96   :  { %4162 = vmatpush3.bf16.msra.mxu0 %v4799_v33 }
  0x97   :  { %4163 = vmatprep.subr.bf16.mxu0 %v5320_v3 }
  0x9a   :  { %4165 = vmatpush3.bf16.msra.mxu0 %v4801_v36 }
  0x9b   :  { %4166 = vmatprep.subr.bf16.mxu0 %v5320_v3 }
  0x9e   :  { %4168 = vmatpush3.bf16.msra.mxu0 %v4803_v37 }
  0x9f   :  { %4169 = vmatprep.subr.bf16.mxu0 %v5320_v3 }
  0xa2   :  { %4171 = vmatpush3.bf16.msra.mxu0 %v4806_v38 }
  0xa3   :  { %4172 = vmatprep.subr.bf16.mxu0 %v5320_v3 }
  0xa5   :  { %3535 = vmatmul.mubr.f32.vlgmr.msra.gmra.mrb[0].mxu0 %v4710_v31 }
  0xa6   :  { %4174 = vmatpush3.bf16.msra.mxu0 %v4664_v12  ;;  %3569 = vmatprep.mubr.msk.f32.mxu0 %vm4596_vm0, %v5322_v8 }
  0xa7   :  { %4175 = vmatprep.subr.bf16.mxu0 %v5320_v3 }
  0xaa   :  { %4177 = vmatpush3.bf16.msra.mxu0 %v4667_v13 }
  0xab   :  { %4178 = vmatprep.subr.bf16.mxu0 %v5320_v3 }
  0xae   :  { %4180 = vmatpush3.bf16.msra.mxu0 %v4677_v18 }
  0xaf   :  { %4181 = vmatprep.subr.bf16.mxu0 %v5320_v3 }
  0xb2   :  { %4183 = vmatpush3.bf16.msra.mxu0 %v4713_v32 }
  0xb3   :  { %4184 = vmatprep.subr.bf16.mxu0 %v5320_v3 }
  0xb6   :  { %4186 = vmatpush3.bf16.msra.mxu0 %v4729_v45 }
  0xb7   :  { %4187 = vmatprep.subr.bf16.mxu0 %v5320_v3 }
  0xba   :  { %4189 = vmatpush3.bf16.msra.mxu0 %v4736_v49 }
  0xbb   :  { %4190 = vmatprep.subr.bf16.mxu0 %v5320_v3 }
  0xbe   :  { %4192 = vmatpush3.bf16.msra.mxu0 %v4738_v50 }
  0xbf   :  { %4193 = vmatprep.subr.bf16.mxu0 %v5320_v3 }
  0xc2   :  { %4195 = vmatpush3.bf16.msra.mxu0 %v4740_v51 }
  0xc3   :  { %3812 = vmatprep.subr.mxu0 %v5322_v8 }
  0xc5   :  { %3570 = vmatmul.mubr.f32.vlgmr.msra.gmra.mrb[0].mxu0 %v4710_v31 }
  0xc6   :  { %3814 = vmatprep.mubr.msk.f32.mxu0 %vm4596_vm0, %v5322_v8  ;;  %3813 = vmatpush3.msra.mxu0 %v4971_v52 }
  0xc7   :  { %3817 = vmatprep.subr.mxu0 %v5322_v8 }
 0x198   :  { %v686_v59 = vpop.f32.mrb[0].mxu0 }
 0x199   :  { %4529 = vrcp.f32 %v686_v59  ;;  %v3571_v31 = vpop.f32.mrb[1].mxu0 }
 0x1a3   :  { %v4530_v61 = vpop.eup %4529 }
 0x1a4   :  { %v694_v62 = vsel %vm692_vm1, %v4530_v61, 0 }
 0x1a5   :  { %v762_v0 = vand.u32 4294901760, %v694_v62 }
 0x1a7   :  { %v763_v1 = vsub.f32 %v694_v62, %v762_v0 }
 0x1a9   :  { %v764_v4 = vand.u32 4294901760, %v763_v1 }
 0x1ab   :  { %v765_v9 = vsub.f32 %v763_v1, %v764_v4 }
 0x1ad   :  { %v766_v14 = vand.u32 4294901760, %v765_v9 }
 0x1af   :  { %3575 = vmatmul.mubr.f32.vlgmr.msra.gmra.mrb[0].mxu1 %v766_v14 }
 0x1b0   :  { %3578 = vmatpush3.msra.mxu1 %v4986_v11  ;;  %3579 = vmatprep.mubr.msk.f32.mxu1 %vm4596_vm0, %v5322_v8 }
 0x1b1   :  { %3582 = vmatprep.subr.mxu1 %v5322_v8 }
 0x1b7   :  { %3580 = vmatmul.mubr.f32.vlgmr.msra.gmra.mrb[0].mxu1 %v762_v0 }
 0x1b8   :  { %3583 = vmatpush3.msra.mxu1 %v4978_v60  ;;  %3584 = vmatprep.mubr.msk.f32.mxu1 %vm4596_vm0, %v5322_v8 }
 0x1b9   :  { %3587 = vmatprep.subr.mxu1 %v5322_v8 }
 0x1bf   :  { %3585 = vmatmul.mubr.f32.vlgmr.msra.gmra.mrb[0].mxu1 %v763_v1 }
 0x1c0   :  { %3588 = vmatpush3.msra.mxu1 %v4971_v52  ;;  %3589 = vmatprep.mubr.msk.f32.mxu1 %vm4596_vm0, %v5322_v8 }
 0x1c1   :  { %3592 = vmatprep.subr.mxu1 %v5322_v8 }
 0x1c7   :  { %3590 = vmatmul.mubr.f32.vlgmr.msra.gmra.mrb[0].mxu1 %v764_v4 }
 0x1c8   :  { %3593 = vmatpush3.msra.mxu1 %v4982_v63  ;;  %3594 = vmatprep.mubr.msk.f32.mxu1 %vm4596_vm0, %v5322_v8 }
 0x1c9   :  { %3597 = vmatprep.subr.mxu1 %v5322_v8 }
 0x1cf   :  { %3595 = vmatmul.mubr.f32.vlgmr.msra.gmra.mrb[0].mxu1 %v762_v0 }
 0x1d0   :  { %3598 = vmatpush3.msra.mxu1 %v4971_v52  ;;  %3599 = vmatprep.mubr.msk.f32.mxu1 %vm4596_vm0, %v5322_v8 }
 0x1d1   :  { %4196 = vmatprep.subr.bf16.mxu1 %v5320_v3 }
 0x1d7   :  { %3600 = vmatmul.mubr.f32.vlgmr.msra.gmra.mrb[0].mxu1 %v762_v0 }
 0x1d8   :  { %4198 = vmatpush3.bf16.msra.mxu1 %v4664_v12  ;;  %3634 = vmatprep.mubr.msk.f32.mxu1 %vm4596_vm0, %v5322_v8 }
 0x1d9   :  { %4199 = vmatprep.subr.bf16.mxu1 %v5320_v3 }
 0x1dc   :  { %4201 = vmatpush3.bf16.msra.mxu1 %v4667_v13 }
 0x1dd   :  { %4202 = vmatprep.subr.bf16.mxu1 %v5320_v3 }
 0x1e0   :  { %4204 = vmatpush3.bf16.msra.mxu1 %v4677_v18 }
 0x1e1   :  { %4205 = vmatprep.subr.bf16.mxu1 %v5320_v3 }
 0x1e4   :  { %4207 = vmatpush3.bf16.msra.mxu1 %v4713_v32 }
 0x1e5   :  { %4208 = vmatprep.subr.bf16.mxu1 %v5320_v3 }
 0x1e8   :  { %4210 = vmatpush3.bf16.msra.mxu1 %v4729_v45 }
 0x1e9   :  { %4211 = vmatprep.subr.bf16.mxu1 %v5320_v3 }
 0x1ec   :  { %4213 = vmatpush3.bf16.msra.mxu1 %v4736_v49 }
 0x1ed   :  { %4214 = vmatprep.subr.bf16.mxu1 %v5320_v3 }
 0x1f0   :  { %4216 = vmatpush3.bf16.msra.mxu1 %v4738_v50 }
 0x1f1   :  { %4217 = vmatprep.subr.bf16.mxu1 %v5320_v3 }
 0x1f4   :  { %4219 = vmatpush3.bf16.msra.mxu1 %v4740_v51 }
 0x1f5   :  { %4220 = vmatprep.subr.bf16.mxu1 %v5320_v3 }
 0x1f7   :  { %3635 = vmatmul.mubr.f32.vlgmr.msra.gmra.mrb[2].mxu1 %v1229_v19 }
 0x1f8   :  { %4222 = vmatpush3.bf16.msra.mxu1 %v4810_v41  ;;  %3669 = vmatprep.mubr.msk.f32.mxu1 %vm4596_vm0, %v5322_v8 }
 0x1f9   :  { %4223 = vmatprep.subr.bf16.mxu1 %v5320_v3 }
 0x1fc   :  { %4225 = vmatpush3.bf16.msra.mxu1 %v4816_v56 }
 0x1fd   :  { %4226 = vmatprep.subr.bf16.mxu1 %v5320_v3 }
 0x200   :  { %4228 = vmatpush3.bf16.msra.mxu1 %v4823_v7 }
 0x201   :  { %4229 = vmatprep.subr.bf16.mxu1 %v5320_v3 }
 0x204   :  { %4231 = vmatpush3.bf16.msra.mxu1 %v4830_v16 }
 0x205   :  { %4232 = vmatprep.subr.bf16.mxu1 %v5320_v3 }
 0x208   :  { %4234 = vmatpush3.bf16.msra.mxu1 %v4836_v17 }
 0x209   :  { %4235 = vmatprep.subr.bf16.mxu1 %v5320_v3 }
 0x20c   :  { %4237 = vmatpush3.bf16.msra.mxu1 %v4842_v57 }
 0x20d   :  { %4238 = vmatprep.subr.bf16.mxu1 %v5320_v3 }
 0x210   :  { %4240 = vmatpush3.bf16.msra.mxu1 %v4847_v58 }
 0x211   :  { %4241 = vmatprep.subr.bf16.mxu1 %v5320_v3 }
 0x214   :  { %4243 = vmatpush3.bf16.msra.mxu1 %v4851_v25 }
 0x215   :  { %4244 = vmatprep.subr.bf16.mxu1 %v5320_v3 }
 0x217   :  { %3670 = vmatmul.mubr.f32.vlgmr.msra.gmra.mrb[2].mxu1 %v5022_v39 }
 0x218   :  { %4246 = vmatpush3.bf16.msra.mxu1 %v4857_v26  ;;  %3704 = vmatprep.mubr.msk.f32.mxu1 %vm4596_vm0, %v5322_v8 }
 0x219   :  { %4247 = vmatprep.subr.bf16.mxu1 %v5320_v3 }
 0x21c   :  { %4249 = vmatpush3.bf16.msra.mxu1 %v4864_v10 }
 0x21d   :  { %4250 = vmatprep.subr.bf16.mxu1 %v5320_v3 }
 0x220   :  { %4252 = vmatpush3.bf16.msra.mxu1 %v4872_v34 }
 0x221   :  { %4253 = vmatprep.subr.bf16.mxu1 %v5320_v3 }
 0x224   :  { %4255 = vmatpush3.bf16.msra.mxu1 %v4878_v35 }
 0x225   :  { %4256 = vmatprep.subr.bf16.mxu1 %v5320_v3 }
 0x228   :  { %4258 = vmatpush3.bf16.msra.mxu1 %v4884_v43 }
 0x229   :  { %4259 = vmatprep.subr.bf16.mxu1 %v5320_v3 }
 0x22c   :  { %4261 = vmatpush3.bf16.msra.mxu1 %v4890_v44 }
 0x22d   :  { %4262 = vmatprep.subr.bf16.mxu1 %v5320_v3 }
 0x230   :  { %4264 = vmatpush3.bf16.msra.mxu1 %v4896_v48 }
 0x231   :  { %4265 = vmatprep.subr.bf16.mxu1 %v5320_v3 }
 0x234   :  { %4267 = vmatpush3.bf16.msra.mxu1 %v4902_v55 }
 0x235   :  { %4268 = vmatprep.subr.bf16.mxu1 %v5320_v3 }
 0x237   :  { %3705 = vmatmul.mubr.f32.vlgmr.msra.gmra.mrb[2].mxu1 %v5028_v40 }
 0x238   :  { %4270 = vmatpush3.bf16.msra.mxu1 %v4664_v12  ;;  %3739 = vmatprep.mubr.msk.f32.mxu1 %vm4596_vm0, %v5322_v8 }
 0x239   :  { %4271 = vmatprep.subr.bf16.mxu1 %v5320_v3 }
 0x23c   :  { %4273 = vmatpush3.bf16.msra.mxu1 %v4667_v13 }
 0x23d   :  { %4274 = vmatprep.subr.bf16.mxu1 %v5320_v3 }
 0x240   :  { %4276 = vmatpush3.bf16.msra.mxu1 %v4677_v18 }
 0x241   :  { %4277 = vmatprep.subr.bf16.mxu1 %v5320_v3 }
 0x244   :  { %4279 = vmatpush3.bf16.msra.mxu1 %v4713_v32 }
 0x245   :  { %4280 = vmatprep.subr.bf16.mxu1 %v5320_v3 }
 0x248   :  { %4282 = vmatpush3.bf16.msra.mxu1 %v4729_v45 }
 0x249   :  { %4283 = vmatprep.subr.bf16.mxu1 %v5320_v3 }
 0x24c   :  { %4285 = vmatpush3.bf16.msra.mxu1 %v4736_v49 }
 0x24d   :  { %4286 = vmatprep.subr.bf16.mxu1 %v5320_v3 }
 0x250   :  { %4288 = vmatpush3.bf16.msra.mxu1 %v4738_v50 }
 0x251   :  { %4289 = vmatprep.subr.bf16.mxu1 %v5320_v3 }
 0x254   :  { %4291 = vmatpush3.bf16.msra.mxu1 %v4740_v51 }
 0x255   :  { %4292 = vmatprep.subr.bf16.mxu1 %v5320_v3 }
 0x257   :  { %3740 = vmatmul.mubr.f32.vlgmr.msra.gmra.mrb[2].mxu1 %v1227_v46 }
 0x258   :  { %4294 = vmatpush3.bf16.msra.mxu1 %v4790_v27  ;;  %3774 = vmatprep.mubr.msk.f32.mxu1 %vm4596_vm0, %v5322_v8 }
 0x259   :  { %4295 = vmatprep.subr.bf16.mxu1 %v5320_v3 }
 0x25c   :  { %4297 = vmatpush3.bf16.msra.mxu1 %v4792_v28 }
 0x25d   :  { %4298 = vmatprep.subr.bf16.mxu1 %v5320_v3 }
 0x260   :  { %4300 = vmatpush3.bf16.msra.mxu1 %v4794_v29 }
 0x261   :  { %4301 = vmatprep.subr.bf16.mxu1 %v5320_v3 }
 0x264   :  { %4303 = vmatpush3.bf16.msra.mxu1 %v4797_v30 }
 0x265   :  { %4304 = vmatprep.subr.bf16.mxu1 %v5320_v3 }
 0x268   :  { %4306 = vmatpush3.bf16.msra.mxu1 %v4799_v33 }
 0x269   :  { %4307 = vmatprep.subr.bf16.mxu1 %v5320_v3 }
 0x26c   :  { %4309 = vmatpush3.bf16.msra.mxu1 %v4801_v36 }
 0x26d   :  { %4310 = vmatprep.subr.bf16.mxu1 %v5320_v3 }
 0x270   :  { %4312 = vmatpush3.bf16.msra.mxu1 %v4803_v37 }
 0x271   :  { %4313 = vmatprep.subr.bf16.mxu1 %v5320_v3 }
 0x274   :  { %4315 = vmatpush3.bf16.msra.mxu1 %v4806_v38 }
 0x275   :  { %4316 = vmatprep.subr.bf16.mxu1 %v5320_v3 }
 0x277   :  { %3775 = vmatmul.mubr.f32.vlgmr.msra.gmra.mrb[2].mxu1 %v5022_v39 }
 0x278   :  { %4318 = vmatpush3.bf16.msra.mxu1 %v4664_v12  ;;  %3809 = vmatprep.mubr.msk.f32.mxu1 %vm4596_vm0, %v5322_v8 }
 0x279   :  { %4319 = vmatprep.subr.bf16.mxu1 %v5320_v3 }
 0x27c   :  { %4321 = vmatpush3.bf16.msra.mxu1 %v4667_v13 }
 0x27d   :  { %4322 = vmatprep.subr.bf16.mxu1 %v5320_v3 }
 0x280   :  { %4324 = vmatpush3.bf16.msra.mxu1 %v4677_v18 }
 0x281   :  { %4325 = vmatprep.subr.bf16.mxu1 %v5320_v3 }
 0x284   :  { %4327 = vmatpush3.bf16.msra.mxu1 %v4713_v32 }
 0x285   :  { %4328 = vmatprep.subr.bf16.mxu1 %v5320_v3 }
 0x288   :  { %4330 = vmatpush3.bf16.msra.mxu1 %v4729_v45 }
 0x289   :  { %4331 = vmatprep.subr.bf16.mxu1 %v5320_v3 }
 0x28c   :  { %4333 = vmatpush3.bf16.msra.mxu1 %v4736_v49 }
 0x28d   :  { %4334 = vmatprep.subr.bf16.mxu1 %v5320_v3 }
 0x290   :  { %4336 = vmatpush3.bf16.msra.mxu1 %v4738_v50 }
 0x291   :  { %4337 = vmatprep.subr.bf16.mxu1 %v5320_v3 }
 0x294   :  { %4339 = vmatpush3.bf16.msra.mxu1 %v4740_v51 }
 0x295   :  { %4340 = vmatprep.subr.bf16.mxu1 %v5320_v3 }
 0x297   :  { %3810 = vmatmul.mubr.f32.vlgmr.msra.gmra.mrb[2].mxu1 %v5022_v39 }
 0x298   :  { %4342 = vmatpush3.bf16.msra.mxu1 %v4664_v12  ;;  %3874 = vmatprep.mubr.msk.f32.mxu1 %vm4596_vm0, %v5322_v8 }
 0x299   :  { %4343 = vmatprep.subr.bf16.mxu1 %v5320_v3 }
 0x29c   :  { %4345 = vmatpush3.bf16.msra.mxu1 %v4667_v13 }
 0x29d   :  { %4346 = vmatprep.subr.bf16.mxu1 %v5320_v3 }
 0x2a0   :  { %4348 = vmatpush3.bf16.msra.mxu1 %v4677_v18 }
 0x2a1   :  { %4349 = vmatprep.subr.bf16.mxu1 %v5320_v3 }
 0x2a4   :  { %4351 = vmatpush3.bf16.msra.mxu1 %v4713_v32 }
 0x2a5   :  { %4352 = vmatprep.subr.bf16.mxu1 %v5320_v3 }
 0x2a8   :  { %4354 = vmatpush3.bf16.msra.mxu1 %v4729_v45 }
 0x2a9   :  { %4355 = vmatprep.subr.bf16.mxu1 %v5320_v3 }
 0x2aa   :  { %v1138_v53 = vpop.f32.mrb[0].mxu1 }
 0x2ab   :  { %v1142_v20 = vmul.f32 %v1138_v53, %v4685_v22  ;;  %v3601_v54 = vpop.f32.mrb[1].mxu1 }
 0x2ac   :  { %4357 = vmatpush3.bf16.msra.mxu1 %v4736_v49 }
 0x2ad   :  { %1143 = vst [vmem:[#allocation3] sm:$0x1] %v1142_v20  ;;  %4358 = vmatprep.subr.bf16.mxu1 %v5320_v3 }
 0x2b0   :  { %4360 = vmatpush3.bf16.msra.mxu1 %v4738_v50 }
 0x2b1   :  { %4361 = vmatprep.subr.bf16.mxu1 %v5320_v3 }
 0x2b4   :  { %4363 = vmatpush3.bf16.msra.mxu1 %v4740_v51 }
 0x2b5   :  { %4388 = vmatprep.subr.bf16.mxu1 %v5320_v3 }
 0x36a   :  { %v1781_v21 = vpop.f32.mrb[2].mxu1 }
 0x36b   :  { %v1875_v5 = vadd.f32 8.0, %v1781_v21  ;;  %v3811_v23 = vpop.f32.mrb[3].mxu1  ;;  %v1844_v6 = vadd.f32 1.0, %v1781_v21  ;;  %v1845_v24 = vadd.f32 2.0, %v1781_v21  ;;  %v1846_v22 = vadd.f32 3.0, %v1781_v21 }
 0x36c   :  { %v1847_v42 = vadd.f32 4.0, %v1781_v21  ;;  %v1848_v59 = vadd.f32 5.0, %v1781_v21  ;;  %v1849_v31 = vadd.f32 6.0, %v1781_v21  ;;  %v1850_v61 = vadd.f32 7.0, %v1781_v21 }
 0x36d   :  { %4531 = vrcp.f32 %v1875_v5  ;;  %v1851_v62 = vmul.f32 %v1844_v6, %v1781_v21  ;;  %v1852_v0 = vadd.f32 %v1844_v6, %v1781_v21  ;;  %v1853_v1 = vmul.f32 %v1846_v22, %v1845_v24 }
 0x36e   :  { %v1854_v2 = vadd.f32 %v1846_v22, %v1845_v24  ;;  %v1855_v4 = vmul.f32 %v1848_v59, %v1847_v42  ;;  %v1856_v9 = vadd.f32 %v1848_v59, %v1847_v42  ;;  %v1857_v14 = vmul.f32 %v1850_v61, %v1849_v31 }
 0x36f   :  { %v1858_v39 = vadd.f32 %v1850_v61, %v1849_v31  ;;  %v1859_v40 = vmul.f32 %v1853_v1, %v1851_v62  ;;  %4533 = vlog2.f32 %v1875_v5  ;;  %v1861_v47 = vmul.f32 %v1853_v1, %v1852_v0 }
 0x370   :  { %v1860_v46 = vmul.f32 %v1857_v14, %v1855_v4  ;;  %v1862_v19 = vmul.f32 %v1854_v2, %v1851_v62  ;;  %v1864_v53 = vmul.f32 %v1857_v14, %v1856_v9  ;;  %v3031_v42 = vadd.f32 -0.5, %v1875_v5 }
 0x371   :  { %v1865_v20 = vmul.f32 %v1858_v39, %v1855_v4 }
 0x372   :  { %v1867_v54 = vmul.f32 %v1860_v46, %v1859_v40  ;;  %v1863_v23 = vadd.f32 %v1862_v19, %v1861_v47 }
 0x373   :  { %v1866_v3 = vadd.f32 %v1865_v20, %v1864_v53 }
 0x374   :  { %4535 = vrcp.f32 %v1867_v54  ;;  %v1870_v24 = vmul.f32 %v1863_v23, %v1860_v46 }
 0x375   :  { %4537 = vlog2.f32 %v1867_v54  ;;  %v1871_v22 = vmul.f32 %v1866_v3, %v1859_v40 }
 0x377   :  { %v4532_v8 = vpop.eup %4531  ;;  %v1872_v1 = vadd.f32 %v1871_v22, %v1870_v24 }
 0x378   :  { %v1880_v21 = vmul.f32 %v4532_v8, %v4532_v8  ;;  %v1894_v38 = vmul.f32 0.5, %v4532_v8 }
 0x379   :  { %v4534_v6 = vpop.eup %4533 }
 0x37a   :  { %v1877_v59 = vmul.f32 0.6931472, %v4534_v6  ;;  %v1897_v31 = vmul.f32 0.003968254, %v1880_v21  ;;  %v1886_v61 = vmul.f32 -0.0005952381, %v1880_v21 }
 0x37c   :  { %v1898_v37 = vsub.f32 0.008333334, %v1897_v31  ;;  %v1882_v0 = vmul.f32 %v3031_v42, %v1877_v59  ;;  %v1887_v62 = vadd.f32 0.0007936508, %v1886_v61  ;;  %v1895_v19 = vsub.f32 %v1877_v59, %v1894_v38 }
 0x37d   :  { %v5330_v59 = vmov 0.0  }
 0x37e   :  { %v4536_v2 = vpop.eup %4535  ;;  %v1899_v4 = vmul.f32 %v1898_v37, %v1880_v21  ;;  %v1883_v9 = vsub.f32 %v1882_v0, %v1875_v5  ;;  %v1888_v14 = vmul.f32 %v1887_v62, %v1880_v21 }
 0x37f   :  { %v4538_v39 = vpop.eup %4537  ;;  %v1874_v47 = vmul.f32 %v4536_v2, %v1872_v1 }
 0x380   :  { %v1900_v53 = vsub.f32 0.083333336, %v1899_v4  ;;  %v1869_v20 = vmul.f32 0.6931472, %v4538_v39  ;;  %v1884_v46 = vadd.f32 0.9189385, %v1883_v9 }
 0x381   :  { %v1889_v3 = vadd.f32 -0.0027777778, %v1888_v14  ;;  %v1896_v40 = vsub.f32 %v1895_v19, %v1874_v47 }
 0x382   :  { %v1901_v54 = vmul.f32 %v1900_v53, %v1880_v21  ;;  %v1885_v23 = vsub.f32 %v1884_v46, %v1869_v20 }
 0x383   :  { %v1890_v6 = vmul.f32 %v1889_v3, %v1880_v21 }
 0x384   :  { %v1902_v36 = vsub.f32 %v1896_v40, %v1901_v54 }
 0x385   :  { %v1891_v31 = vadd.f32 0.083333336, %v1890_v6 }
 0x386   :  { %v1905_v42 = vsel %vm692_vm1, %v1902_v36, 0  ;;  %v1816_v36 = vadd.f32 8.0, %v5018_v15 }
 0x387   :  { %v1973_v24 = vand.u32 4294901760, %v1905_v42  ;;  %v1892_v22 = vmul.f32 %v4532_v8, %v1891_v31  ;;  %v5331_v8 = vmov 0.0|0.0  }
 0x388   :  { %4539 = vrcp.f32 %v1816_v36 }
 0x389   :  { %v1974_v37 = vsub.f32 %v1905_v42, %v1973_v24  ;;  %v5154_v5 = vadd.f32 %v1892_v22, %v1885_v23  ;;  %4541 = vlog2.f32 %v1816_v36  ;;  %v3030_v42 = vadd.f32 -0.5, %v1816_v36 }
 0x38b   :  { %v1975_v61 = vand.u32 4294901760, %v1974_v37 }
 0x38d   :  { %v1976_v0 = vsub.f32 %v1974_v37, %v1975_v61 }
 0x38f   :  { %v1977_v38 = vand.u32 4294901760, %v1976_v0 }
 0x391   :  { %3815 = vmatmul.mubr.f32.vlgmr.msra.gmra.mrb[2].mxu0 %v1977_v38 }
 0x392   :  { %3818 = vmatpush3.msra.mxu0 %v4986_v11  ;;  %3819 = vmatprep.mubr.msk.f32.mxu0 %vm4596_vm0, %v5330_v59  ;;  %v4540_v11 = vpop.eup %4539 }
 0x393   :  { %3822 = vmatprep.subr.mxu0 %v5330_v59  ;;  %v1821_v14 = vmul.f32 %v4540_v11, %v4540_v11  ;;  %v4542_v6 = vpop.eup %4541  ;;  %v1835_v0 = vmul.f32 0.5, %v4540_v11 }
 0x394   :  { %v1818_v22 = vmul.f32 0.6931472, %v4542_v6 }
 0x395   :  { %v1827_v46 = vmul.f32 -0.0005952381, %v1821_v14  ;;  %v1838_v23 = vmul.f32 0.003968254, %v1821_v14 }
 0x397   :  { %v1828_v54 = vadd.f32 0.0007936508, %v1827_v46 }
 0x399   :  { %3820 = vmatmul.mubr.f32.vlgmr.msra.gmra.mrb[2].mxu0 %v1973_v24 }
 0x39a   :  { %3823 = vmatpush3.msra.mxu0 %v4978_v60  ;;  %3824 = vmatprep.mubr.msk.f32.mxu0 %vm4596_vm0, %v5330_v59 }
 0x39b   :  { %3827 = vmatprep.subr.mxu0 %v5330_v59 }
 0x3a1   :  { %3825 = vmatmul.mubr.f32.vlgmr.msra.gmra.mrb[2].mxu0 %v1974_v37  ;;  %v1829_v37 = vmul.f32 %v1828_v54, %v1821_v14 }
 0x3a2   :  { %3828 = vmatpush3.msra.mxu0 %v4971_v52  ;;  %3829 = vmatprep.mubr.msk.f32.mxu0 %vm4596_vm0, %v5330_v59 }
 0x3a3   :  { %3832 = vmatprep.subr.mxu0 %v5330_v59 }
 0x3a9   :  { %3830 = vmatmul.mubr.f32.vlgmr.msra.gmra.mrb[2].mxu0 %v1975_v61  ;;  %v1839_v61 = vsub.f32 0.008333334, %v1838_v23 }
 0x3aa   :  { %3833 = vmatpush3.msra.mxu0 %v4982_v63  ;;  %3834 = vmatprep.mubr.msk.f32.mxu0 %vm4596_vm0, %v5330_v59 }
 0x3ab   :  { %3837 = vmatprep.subr.mxu0 %v5330_v59 }
 0x3b1   :  { %3835 = vmatmul.mubr.f32.vlgmr.msra.gmra.mrb[2].mxu0 %v1973_v24 }
 0x3b2   :  { %3838 = vmatpush3.msra.mxu0 %v4971_v52  ;;  %3839 = vmatprep.mubr.msk.f32.mxu0 %vm4596_vm0, %v5330_v59 }
 0x3b3   :  { %4364 = vmatprep.subr.bf16.mxu0 %v5331_v8 }
 0x3b9   :  { %3840 = vmatmul.mubr.f32.vlgmr.msra.gmra.mrb[2].mxu0 %v1973_v24 }
 0x3ba   :  { %4366 = vmatpush3.bf16.msra.mxu0 %v4810_v41  ;;  %3909 = vmatprep.mubr.msk.f32.mxu0 %vm4596_vm0, %v5330_v59  ;;  %v1785_v41 = vadd.f32 1.0, %v5018_v15 }
 0x3bb   :  { %4367 = vmatprep.subr.bf16.mxu0 %v5331_v8 }
 0x3bc   :  { %v1793_v21 = vadd.f32 %v1785_v41, %v5018_v15 }
 0x3be   :  { %4369 = vmatpush3.bf16.msra.mxu0 %v4816_v56  ;;  %v1786_v56 = vadd.f32 2.0, %v5018_v15 }
 0x3bf   :  { %4370 = vmatprep.subr.bf16.mxu0 %v5331_v8 }
 0x3c2   :  { %4372 = vmatpush3.bf16.msra.mxu0 %v4823_v7  ;;  %v1787_v7 = vadd.f32 3.0, %v5018_v15 }
 0x3c3   :  { %4373 = vmatprep.subr.bf16.mxu0 %v5331_v8 }
 0x3c4   :  { %v1794_v52 = vmul.f32 %v1787_v7, %v1786_v56  ;;  %v1795_v62 = vadd.f32 %v1787_v7, %v1786_v56  ;;  %v1830_v56 = vadd.f32 -0.0027777778, %v1829_v37  ;;  %v1840_v7 = vmul.f32 %v1839_v61, %v1821_v14 }
 0x3c6   :  { %4375 = vmatpush3.bf16.msra.mxu0 %v4830_v16  ;;  %v1788_v16 = vadd.f32 4.0, %v5018_v15  ;;  %v1802_v39 = vmul.f32 %v1794_v52, %v1793_v21 }
 0x3c7   :  { %4376 = vmatprep.subr.bf16.mxu0 %v5331_v8 }
 0x3ca   :  { %4378 = vmatpush3.bf16.msra.mxu0 %v4836_v17  ;;  %v1789_v17 = vadd.f32 5.0, %v5018_v15 }
 0x3cb   :  { %4379 = vmatprep.subr.bf16.mxu0 %v5331_v8 }
 0x3cc   :  { %v1796_v60 = vmul.f32 %v1789_v17, %v1788_v16  ;;  %v1797_v4 = vadd.f32 %v1789_v17, %v1788_v16  ;;  %v1836_v17 = vsub.f32 %v1818_v22, %v1835_v0 }
 0x3ce   :  { %4381 = vmatpush3.bf16.msra.mxu0 %v4842_v57  ;;  %v1790_v57 = vadd.f32 6.0, %v5018_v15 }
 0x3cf   :  { %4382 = vmatprep.subr.bf16.mxu0 %v5331_v8 }
 0x3d2   :  { %4384 = vmatpush3.bf16.msra.mxu0 %v4847_v58  ;;  %v1791_v58 = vadd.f32 7.0, %v5018_v15 }
 0x3d3   :  { %4385 = vmatprep.subr.bf16.mxu0 %v5331_v8 }
 0x3d4   :  { %v1798_v63 = vmul.f32 %v1791_v58, %v1790_v57  ;;  %v1799_v9 = vadd.f32 %v1791_v58, %v1790_v57 }
 0x3d6   :  { %4387 = vmatpush3.bf16.msra.mxu0 %v4851_v25  ;;  %v1792_v25 = vmul.f32 %v1785_v41, %v5018_v15  ;;  %v1801_v2 = vmul.f32 %v1798_v63, %v1796_v60  ;;  %v1805_v53 = vmul.f32 %v1798_v63, %v1797_v4  ;;  %v1806_v20 = vmul.f32 %v1799_v9, %v1796_v60  ;;  %v30_v4 = vld [vmem:[%s5313_s1] sm:$0x1]  ;;  %s4598_s1 = smov [#allocation3]  }
 0x3d7   :  { %4412 = vmatprep.subr.bf16.mxu0 %v5331_v8  ;;  %v1823_v41 = vmul.f32 %v3030_v42, %v1818_v22  ;;  %v1841_v60 = vsub.f32 0.083333336, %v1840_v7  ;;  %s3008_s14 = sshll.u32 %s4598_s1, 4  ;;  %s3009_s14 = int_to_ptr.vmem [resolvable:$true] %s3008_s14 }
 0x3d8   :  { %v1800_v1 = vmul.f32 %v1794_v52, %v1792_v25  ;;  %v1803_v47 = vmul.f32 %v1795_v62, %v1792_v25  ;;  %v1807_v40 = vadd.f32 %v1806_v20, %v1805_v53  ;;  %v1831_v52 = vmul.f32 %v1830_v56, %v1821_v14  ;;  %s4547_s15 = scalar_lea.vmem %s3009_s14, 16  ;;  %s4551_s16 = scalar_lea.vmem %s3009_s14, 32 }
 0x3d9   :  { %v1824_v25 = vsub.f32 %v1823_v41, %v1816_v36  ;;  %p4548_p0 = scmp.ne.s32.totalorder %s3009_s14, %s4547_s15  ;;  %p4552_p1 = scmp.lt.s32.totalorder %s3009_s14, %s3009_s14 }
 0x3da   :  { %v1808_v19 = vmul.f32 %v1801_v2, %v1800_v1  ;;  %v1804_v3 = vadd.f32 %v1803_v47, %v1802_v39  ;;  %v1812_v24 = vmul.f32 %v1807_v40, %v1800_v1  ;;  %v1832_v62 = vadd.f32 0.083333336, %v1831_v52  ;;  %p4553_p2 = scmp.lt.s32.totalorder %s4551_s16, %s4547_s15 }
 0x3db   :  { %v1825_v21 = vadd.f32 0.9189385, %v1824_v25  ;;  %v1842_v1 = vmul.f32 %v1841_v60, %v1821_v14 }
 0x3dc   :  { %4543 = vrcp.f32 %v1808_v19  ;;  %v1811_v31 = vmul.f32 %v1804_v3, %v1801_v2  ;;  %v1833_v39 = vmul.f32 %v4540_v11, %v1832_v62  ;;  %p4554_p3 = por %p4553_p2, %p4552_p1 }
 0x3dd   :  { %4545 = vlog2.f32 %v1808_v19  ;;  %v1903_v19 = vsub.f32 %v5018_v15, %v30_v4 }
 0x3de   :  { %v1813_v38 = vadd.f32 %v1812_v24, %v1811_v31  ;;  %p4555_p4 = pnand %p4554_p3, %p4548_p0 }
 0x3e6   :  { %v4544_v16 = vpop.eup %4543 }
 0x3e7   :  { %v4546_v57 = vpop.eup %4545  ;;  %v1815_v58 = vmul.f32 %v4544_v16, %v1813_v38 }
 0x3e8   :  { %v1810_v63 = vmul.f32 0.6931472, %v4546_v57 }
 0x3e9   :  { %v1837_v2 = vsub.f32 %v1836_v17, %v1815_v58 }
 0x3ea   :  { %v1826_v9 = vsub.f32 %v1825_v21, %v1810_v63 }
 0x3eb   :  { %v1843_v47 = vsub.f32 %v1837_v2, %v1842_v1 }
 0x3ec   :  { %v1834_v20 = vadd.f32 %v1833_v39, %v1826_v9 }
 0x48c   :  { %v2349_v53 = vpop.f32.mrb[2].mxu0 }
 0x48d   :  { %v2353_v46 = vsub.f32 %v1843_v47, %v2349_v53  ;;  %v3841_v36 = vpop.f32.mrb[3].mxu0 }
 0x48f   :  { %v2354_v3 = vmul.f32 %v2353_v46, %v1903_v19 }
 0x491   :  { %v2355_v40 = vsub.f32 %v2354_v3, %v1834_v20 }
 0x493   :  { %v5208_v54 = vand.u32 4294901760, %v2355_v40 }
 0x495   :  { %v2440_v23 = vsub.f32 %v2355_v40, %v5208_v54  ;;  %3910 = vmatmul.mubr.f32.vlgmr.msra.gmra.mrb[4].mxu0 %v5208_v54 }
 0x496   :  { %4414 = vmatpush3.bf16.msra.mxu0 %v4664_v12  ;;  %3979 = vmatprep.mubr.msk.f32.mxu0 %vm4596_vm0, %v5330_v59 }
 0x497   :  { %4415 = vmatprep.subr.bf16.mxu0 %v5331_v8  ;;  %v2441_v15 = vand.u32 4294901760, %v2440_v23 }
 0x499   :  { %v2442_v11 = vsub.f32 %v2440_v23, %v2441_v15 }
 0x49a   :  { %4417 = vmatpush3.bf16.msra.mxu0 %v4667_v13 }
 0x49b   :  { %4418 = vmatprep.subr.bf16.mxu0 %v5331_v8  ;;  %v2443_v14 = vand.u32 4294901760, %v2442_v11 }
 0x49d   :  { %3875 = vmatmul.mubr.f32.vlgmr.msra.gmra.mrb[4].mxu1 %v2443_v14 }
 0x49e   :  { %4390 = vmatpush3.bf16.msra.mxu1 %v4857_v26  ;;  %4420 = vmatpush3.bf16.msra.mxu0 %v4677_v18 }
 0x49f   :  { %4391 = vmatprep.subr.bf16.mxu1 %v5331_v8  ;;  %4421 = vmatprep.subr.bf16.mxu0 %v5331_v8 }
 0x4a0   :  { %3944 = vmatprep.mubr.msk.f32.mxu1 %vm4596_vm0, %v5330_v59 }
 0x4a2   :  { %4393 = vmatpush3.bf16.msra.mxu1 %v4864_v10  ;;  %4423 = vmatpush3.bf16.msra.mxu0 %v4713_v32 }
 0x4a3   :  { %4394 = vmatprep.subr.bf16.mxu1 %v5331_v8  ;;  %4424 = vmatprep.subr.bf16.mxu0 %v5331_v8 }
 0x4a6   :  { %4396 = vmatpush3.bf16.msra.mxu1 %v4872_v34  ;;  %4426 = vmatpush3.bf16.msra.mxu0 %v4729_v45 }
 0x4a7   :  { %4397 = vmatprep.subr.bf16.mxu1 %v5331_v8  ;;  %4427 = vmatprep.subr.bf16.mxu0 %v5331_v8 }
 0x4aa   :  { %4399 = vmatpush3.bf16.msra.mxu1 %v4878_v35  ;;  %4429 = vmatpush3.bf16.msra.mxu0 %v4736_v49 }
 0x4ab   :  { %4400 = vmatprep.subr.bf16.mxu1 %v5331_v8  ;;  %4430 = vmatprep.subr.bf16.mxu0 %v5331_v8 }
 0x4ae   :  { %4402 = vmatpush3.bf16.msra.mxu1 %v4884_v43  ;;  %4432 = vmatpush3.bf16.msra.mxu0 %v4738_v50 }
 0x4af   :  { %4403 = vmatprep.subr.bf16.mxu1 %v5331_v8  ;;  %4433 = vmatprep.subr.bf16.mxu0 %v5331_v8 }
 0x4b2   :  { %4405 = vmatpush3.bf16.msra.mxu1 %v4890_v44  ;;  %4435 = vmatpush3.bf16.msra.mxu0 %v4740_v51 }
 0x4b3   :  { %4406 = vmatprep.subr.bf16.mxu1 %v5331_v8  ;;  %4460 = vmatprep.subr.bf16.mxu0 %v5331_v8 }
 0x4b5   :  { %3980 = vmatmul.mubr.f32.vlgmr.msra.gmra.mrb[6].mxu0 %v2441_v15 }
 0x4b6   :  { %4408 = vmatpush3.bf16.msra.mxu1 %v4896_v48  ;;  %4462 = vmatpush3.bf16.msra.mxu0 %v4664_v12  ;;  %v5332_v12 = vld [vmem:[#allocation9_spill] sm:$0xff] }
 0x4b7   :  { %4409 = vmatprep.subr.bf16.mxu1 %v5331_v8  ;;  %4463 = vmatprep.subr.bf16.mxu0 %v5331_v8 }
 0x4b8   :  { %4049 = vmatprep.mubr.msk.f32.mxu0 %vm4596_vm0, %v5330_v59 }
 0x4ba   :  { %4411 = vmatpush3.bf16.msra.mxu1 %v4902_v55  ;;  %4465 = vmatpush3.bf16.msra.mxu0 %v4667_v13  ;;  %v5333_v13 = vld [vmem:[#allocation10_spill] sm:$0xff] }
 0x4bb   :  { %4436 = vmatprep.subr.bf16.mxu1 %v5331_v8  ;;  %4466 = vmatprep.subr.bf16.mxu0 %v5331_v8 }
 0x4bd   :  { %3945 = vmatmul.mubr.f32.vlgmr.msra.gmra.mrb[6].mxu1 %v2440_v23 }
 0x4be   :  { %4438 = vmatpush3.bf16.msra.mxu1 %v4790_v27  ;;  %4468 = vmatpush3.bf16.msra.mxu0 %v4677_v18  ;;  %v5334_v18 = vld [vmem:[#allocation11_spill] sm:$0xff] }
 0x4bf   :  { %4439 = vmatprep.subr.bf16.mxu1 %v5331_v8  ;;  %4469 = vmatprep.subr.bf16.mxu0 %v5331_v8 }
 0x4c0   :  { %4014 = vmatprep.mubr.msk.f32.mxu1 %vm4596_vm0, %v5330_v59 }
 0x4c2   :  { %4441 = vmatpush3.bf16.msra.mxu1 %v4792_v28  ;;  %4471 = vmatpush3.bf16.msra.mxu0 %v4713_v32 }
 0x4c3   :  { %4442 = vmatprep.subr.bf16.mxu1 %v5331_v8  ;;  %4472 = vmatprep.subr.bf16.mxu0 %v5331_v8 }
 0x4c6   :  { %4444 = vmatpush3.bf16.msra.mxu1 %v4794_v29  ;;  %4474 = vmatpush3.bf16.msra.mxu0 %v4729_v45 }
 0x4c7   :  { %4445 = vmatprep.subr.bf16.mxu1 %v5331_v8  ;;  %4475 = vmatprep.subr.bf16.mxu0 %v5331_v8 }
 0x4ca   :  { %4447 = vmatpush3.bf16.msra.mxu1 %v4797_v30  ;;  %4477 = vmatpush3.bf16.msra.mxu0 %v4736_v49 }
 0x4cb   :  { %4448 = vmatprep.subr.bf16.mxu1 %v5331_v8  ;;  %4478 = vmatprep.subr.bf16.mxu0 %v5331_v8 }
 0x4ce   :  { %4450 = vmatpush3.bf16.msra.mxu1 %v4799_v33  ;;  %4480 = vmatpush3.bf16.msra.mxu0 %v4738_v50 }
 0x4cf   :  { %4451 = vmatprep.subr.bf16.mxu1 %v5331_v8  ;;  %4481 = vmatprep.subr.bf16.mxu0 %v5331_v8 }
 0x4d2   :  { %4453 = vmatpush3.bf16.msra.mxu1 %v5332_v12  ;;  %4483 = vmatpush3.bf16.msra.mxu0 %v4740_v51 }
 0x4d3   :  { %4454 = vmatprep.subr.bf16.mxu1 %v5331_v8 }
 0x4d5   :  { %4050 = vmatmul.mubr.f32.vlgmr.msra.gmra.mrb[8].mxu0 %v5208_v54 }
 0x4d6   :  { %4456 = vmatpush3.bf16.msra.mxu1 %v5333_v13 }
 0x4d7   :  { %4457 = vmatprep.subr.bf16.mxu1 %v5331_v8 }
 0x4da   :  { %4459 = vmatpush3.bf16.msra.mxu1 %v5334_v18 }
 0x4dd   :  { %4015 = vmatmul.mubr.f32.vlgmr.msra.gmra.mrb[8].mxu1 %v5208_v54 }
 0x4de   :  { %4558 = shalt.err (!%p4555_p4)
}
 0x4df   :  { %s4559_s19 = scalar_lea.hbm %s5318_s6, 16 }
 0x4e0   :  { %p4560_p5 = scmp.ne.s32.totalorder %s5318_s6, %s4559_s19  ;;  %p4563_p6 = scmp.lt.u32.totalorder %s4559_s19, %s5318_s6 }
 0x4e2   :  { %p4565_p7 = pnand %p4563_p6, %p4560_p5 }
 0x4e4   :  { %4568 = shalt.err (!%p4565_p7)
}
 0x4e5   :  { %3011 = dma.vmem_to_hbm [thread:$0]  %s3009_s14, 16, %s5318_s6, [#allocation4]   ;;  %v2356_v43 = vstv %s5312_s0  ;;  %vm3000_vm2 = vcmask 57344  }
 0x4e6   :  { %s4599_s6 = smov [#allocation5]   ;;  %v2357_v59 = vadd.f32 %v2356_v43, %v5154_v5 }
 0x4e7   :  { %s3018_s28 = sshll.u32 %s4599_s6, 4  ;;  %s3019_s28 = int_to_ptr.vmem [resolvable:$true] %s3018_s28 }
 0x4e8   :  { %s4569_s5 = scalar_lea.vmem %s3019_s28, 16  ;;  %s4573_s29 = scalar_lea.vmem %s3019_s28, 32 }
 0x4e9   :  { %p4570_p8 = scmp.ne.s32.totalorder %s3019_s28, %s4569_s5  ;;  %p4574_p9 = scmp.lt.s32.totalorder %s3019_s28, %s3019_s28 }
 0x4ea   :  { %p4575_p10 = scmp.lt.s32.totalorder %s4573_s29, %s4569_s5 }
 0x4ec   :  { %p4576_p11 = por %p4575_p10, %p4574_p9 }
 0x4ee   :  { %p4577_p12 = pnand %p4576_p11, %p4570_p8 }
 0x568   :  { %v2596_v32 = vpop.f32.mrb[4].mxu0 }
 0x569   :  { %v3911_v45 = vpop.f32.mrb[5].mxu0 }
 0x570   :  { %v2445_v49 = vpop.f32.mrb[4].mxu1 }
 0x571   :  { %v2597_v50 = vadd.f32 %v2596_v32, %v2445_v49  ;;  %v3876_v51 = vpop.f32.mrb[5].mxu1 }
 0x588   :  { %v2789_v27 = vpop.f32.mrb[6].mxu0 }
 0x589   :  { %v3981_v28 = vpop.f32.mrb[7].mxu0 }
 0x590   :  { %v2700_v29 = vpop.f32.mrb[6].mxu1 }
 0x591   :  { %v2701_v30 = vadd.f32 %v2700_v29, %v2597_v50  ;;  %v3946_v33 = vpop.f32.mrb[7].mxu1 }
 0x593   :  { %v2790_v26 = vadd.f32 %v2789_v27, %v2701_v30 }
 0x5a8   :  { %v2995_v10 = vpop.f32.mrb[8].mxu0 }
 0x5a9   :  { %v4051_v34 = vpop.f32.mrb[9].mxu0 }
 0x5b0   :  { %v2908_v35 = vpop.f32.mrb[8].mxu1 }
 0x5b1   :  { %v2909_v44 = vadd.f32 %v2908_v35, %v2790_v26  ;;  %v4016_v48 = vpop.f32.mrb[9].mxu1 }
 0x5b3   :  { %v2996_v55 = vadd.f32 %v2995_v10, %v2909_v44 }
 0x5b5   :  { %v2999_v8 = vadd.f32 %v2996_v55, %v2357_v59 }
 0x5b7   :  { %3001 = vst.msk [vmem:[#allocation5] sm:$0x1] %vm3000_vm2, %v2999_v8 }
 0x5b8   :  { %4580 = shalt.err (!%p4577_p12)
}
 0x5b9   :  { %s4581_s8 = scalar_lea.hbm %s5319_s7, 16 }
 0x5ba   :  { %p4582_p13 = scmp.ne.s32.totalorder %s5319_s7, %s4581_s8  ;;  %p4585_p0 = scmp.lt.u32.totalorder %s4581_s8, %s5319_s7 }
 0x5bc   :  { %p4587_p1 = pnand %p4585_p0, %p4582_p13 }
 0x5be   :  { %4590 = shalt.err (!%p4587_p1)
}
 0x5bf   :  { %3021 = dma.vmem_to_hbm [thread:$0]  %s3019_s28, 16, %s5319_s7, [#allocation6]  }
 0x5c0   :  { %4591 = dma.done.wait [#allocation4], 16  }
 0x5c1   :  { %4592 = vsyncadd [#allocation4], 4294967280 }
 0x5c2   :  { %4593 = dma.done.wait [#allocation6], 16  }
 0x5c3   :  { %4594 = vsyncadd [#allocation6], 4294967280 }
 0x5c4   :  { %3028 = vsyncpa [#allocation4], 1 }
 0x5c5   :  { %3029 = vsyncpa [#allocation6], 1 }

</bundles_post_ra>
